<compile_context>
chip_gen: v7x
topology: tpu7x:2x2x1
jax: 0.10.0
libtpu: 0.0.40
codegen_flags: <defaults>
</compile_context>

<pallas_src>
import functools

import jax
import jax.numpy as jnp
from jax.experimental import pallas as pl
from jax.experimental.pallas import tpu as pltpu


def _round_up(x, m):
    return (x + m - 1) // m * m


def _vmem_capacity_bytes():
    """Physical per-core VMEM with a conservative fallback (v7x per-TC: 64 MiB)."""
    try:
        info = pltpu.get_tpu_info()
        cap = int(getattr(info, "vmem_capacity_bytes", 0) or 0)
        if cap > 0:
            return min(max(cap, 32 << 20), 256 << 20)
    except Exception:
        pass
    return 64 << 20


def _vmem_budgets():
    """(vmem_limit_bytes, tile_budget_bytes) per TPU generation.

    128 MiB parts (v5e/v6e): ~96 MiB scoped limit, ~44 MiB of stream budget.
    64 MiB parts (v7x per TensorCore): ~48 MiB, ~20 MiB.
    """
    cap = _vmem_capacity_bytes()
    vmem_limit = min(int(cap * 0.75), cap - (8 << 20))
    tile_budget = max(vmem_limit // 2 - (4 << 20), 8 << 20)
    return vmem_limit, tile_budget


def _choose_tile_m(m1, cu, cx, co, cxo, in_bytes, out_bytes, budget_bytes, row_align):
    """Rows (up-resolution pixels) per tile, sized against a VMEM budget.

    Counts: double-buffered input/output streams per up-row, the f32
    intermediates of the compute, and (as fixed cost) the double-buffered
    weight matrices, bias/scale/shift vectors and stats accumulator blocks.
    """
    per_row = (2 * (cu + 4 * cx) * in_bytes          # inputs, double-buffered
               + 2 * 4 * (co + cxo) * out_bytes      # apply-pass outputs, double-buffered
               + 3 * 4 * (co + cxo) * 4)             # f32 intermediates (y, relu, square)
    fixed = (2 * (cu * 4 * co + cx * cxo) * in_bytes     # weights (double-buffered)
             + 6 * (4 * co + cxo) * 4                    # bias / scale / shift vectors
             + 2 * 8 * (4 * co + cxo) * 4)               # stats accumulator blocks
    avail = max(budget_bytes - fixed, per_row * row_align)
    tm = avail // per_row
    tm = max(row_align, min(tm, 4096, _round_up(m1, row_align)))
    return _round_up(tm, row_align)


# ----------------------------------------------------------------------------
# Pass 1: per-channel sum / sum^2 of relu(conv(...)), accumulated across tiles,
# split across a leading "parallel" axis (one accumulator block per core).
# ----------------------------------------------------------------------------
def _stats_kernel(up_ref, x_ref, wtr_ref, btr_ref, wx_ref, bx_ref,
                  su_ref, squ_ref, sx_ref, sqx_ref, *, tpc, m1, m2):
    c = pl.program_id(0)          # core-split index ("parallel")
    i = pl.program_id(1)          # tile index within this core's range ("arbitrary")

    @pl.when(i == 0)
    def _init():
        su_ref[...] = jnp.zeros_like(su_ref)
        squ_ref[...] = jnp.zeros_like(squ_ref)
        sx_ref[...] = jnp.zeros_like(sx_ref)
        sqx_ref[...] = jnp.zeros_like(sqx_ref)

    tm_up = up_ref.shape[0]
    tm_x = x_ref.shape[0]
    gt = c * tpc + i              # global tile index (may point past the last tile)

    # Transposed conv (k=2, s=2) == matmul against (Cu, 4*Co); cols = (di,dj,co).
    y_up = jnp.dot(up_ref[...], wtr_ref[...], preferred_element_type=jnp.float32)
    r_up = jnp.maximum(y_up + btr_ref[...], 0.0)
    # 1x1 conv == plain matmul.
    y_x = jnp.dot(x_ref[...], wx_ref[...], preferred_element_type=jnp.float32)
    r_x = jnp.maximum(y_x + bx_ref[...], 0.0)

    def _accum(ru, rx):
        # Sublane-group partial sums (pure VALU adds) into the (8, lanes) blocks.
        su_ref[...] += ru.reshape(tm_up // 8, 8, ru.shape[-1]).sum(axis=0)
        squ_ref[...] += (ru * ru).reshape(tm_up // 8, 8, ru.shape[-1]).sum(axis=0)
        sx_ref[...] += rx.reshape(tm_x // 8, 8, rx.shape[-1]).sum(axis=0)
        sqx_ref[...] += (rx * rx).reshape(tm_x // 8, 8, rx.shape[-1]).sum(axis=0)

    clean = (gt + 1) * tm_up <= m1     # tile lies fully inside the valid row range

    @pl.when(clean)
    def _steady():
        _accum(r_up, r_x)

    @pl.when(jnp.logical_not(clean))
    def _tail():
        # Ragged last tile / clamped duplicate tile: mask invalid rows out of the
        # statistics.  jnp.where (not multiplicative masking) so garbage NaN/Inf
        # lanes cannot propagate.
        row_up = gt * tm_up + jax.lax.broadcasted_iota(jnp.int32, (tm_up, 1), 0)
        row_x = gt * tm_x + jax.lax.broadcasted_iota(jnp.int32, (tm_x, 1), 0)
        _accum(jnp.where(row_up < m1, r_up, 0.0),
               jnp.where(row_x < m2, r_x, 0.0))


# ----------------------------------------------------------------------------
# Pass 2: recompute matmul+ReLU per tile and apply the BN scale / shift.
# ----------------------------------------------------------------------------
def _apply_kernel(up_ref, x_ref, wtr_ref, btr_ref, wx_ref, bx_ref,
                  sc4_ref, sh4_ref, scx_ref, shx_ref,
                  out_up_ref, out_x_ref):
    y_up = jnp.dot(up_ref[...], wtr_ref[...], preferred_element_type=jnp.float32)
    r_up = jnp.maximum(y_up + btr_ref[...], 0.0)
    out_up_ref[...] = (r_up * sc4_ref[...] + sh4_ref[...]).astype(out_up_ref.dtype)

    y_x = jnp.dot(x_ref[...], wx_ref[...], preferred_element_type=jnp.float32)
    r_x = jnp.maximum(y_x + bx_ref[...], 0.0)
    out_x_ref[...] = (r_x * scx_ref[...] + shx_ref[...]).astype(out_x_ref.dtype)


@functools.partial(jax.jit, static_argnames=("tm", "compute_dtype", "out_layout"))
def unet_block_forward(up_p, x_p, w_tr, b_tr, w_x, b_x, gamma, beta,
                       *, tm=None, compute_dtype=jnp.float32, out_layout="NCHW"):
    """up_p: (N, up_in, Hu, Wu) NCHW; x_p: (N, x_in, 2*Hu, 2*Wu) NCHW.

    Returns NCHW (default, matches the PyTorch module) or NHWC
    (out_layout="NHWC": skips the final transpose for channels-last consumers).
    Output dtype == compute_dtype (bf16 halves the dominant HBM term).
    """
    N, Cu, Hu, Wu = up_p.shape
    Nx, Cx, H, W = x_p.shape
    Co = w_tr.shape[1]               # up_out
    Cxo = w_x.shape[0]               # x_out
    M1 = N * Hu * Wu
    M2 = N * H * W
    assert Nx == N and H == 2 * Hu and W == 2 * Wu and M2 == 4 * M1
    assert out_layout in ("NCHW", "NHWC")

    in_bytes = jnp.dtype(compute_dtype).itemsize
    out_bytes = in_bytes
    row_align = 8 if in_bytes >= 4 else (16 if in_bytes == 2 else 32)

    vmem_limit, tile_budget = _vmem_budgets()
    if tm is None:
        tm = _choose_tile_m(M1, Cu, Cx, Co, Cxo, in_bytes, out_bytes,
                            tile_budget, row_align)
    else:
        tm = max(row_align, _round_up(int(tm), row_align))

    n_tiles = pl.cdiv(M1, tm)
    ncores = 2 if n_tiles >= 2 else 1     # leading "parallel" split of the stats pass
    tpc = pl.cdiv(n_tiles, ncores)        # tiles per core

    # ---- layout glue (NCHW -> pixels x channels, channels on the lane axis) --
    up_flat = jnp.transpose(up_p, (0, 2, 3, 1)).reshape(M1, Cu).astype(compute_dtype)
    x_flat = jnp.transpose(x_p, (0, 2, 3, 1)).reshape(M2, Cx).astype(compute_dtype)

    # ConvTranspose2d weight (Cu, Co, 2, 2) -> (Cu, 4*Co); column = (di*2+dj)*Co+co.
    wtr_mat = jnp.transpose(w_tr, (0, 2, 3, 1)).reshape(Cu, 4 * Co).astype(compute_dtype)
    btr4 = jnp.tile(b_tr, 4)[None, :].astype(jnp.float32)          # (1, 4*Co)
    # Conv2d 1x1 weight (Cxo, Cx, 1, 1) -> (Cx, Cxo)
    wx_mat = jnp.transpose(w_x[:, :, 0, 0], (1, 0)).astype(compute_dtype)
    bx = b_x[None, :].astype(jnp.float32)                          # (1, Cxo)

    mm_flops = 2 * M1 * Cu * 4 * Co + 2 * M2 * Cx * Cxo
    act_elems = M1 * 4 * Co + M2 * Cxo
    in_bytes_total = ((M1 * Cu + M2 * Cx) * in_bytes
                      + (Cu * 4 * Co + Cx * Cxo) * in_bytes)

    # ------------------------------ pass 1: stats -----------------------------
    act_map = lambda c, i: (jnp.minimum(c * tpc + i, n_tiles - 1), 0)
    const2 = lambda c, i: (0, 0)
    acc_map = lambda c, i: (c, 0)

    stats_in_specs = [
        pl.BlockSpec((tm, Cu), act_map),
        pl.BlockSpec((4 * tm, Cx), act_map),
        pl.BlockSpec((Cu, 4 * Co), const2),
        pl.BlockSpec((1, 4 * Co), const2),
        pl.BlockSpec((Cx, Cxo), const2),
        pl.BlockSpec((1, Cxo), const2),
    ]
    stats_out_specs = (
        pl.BlockSpec((8, 4 * Co), acc_map),
        pl.BlockSpec((8, 4 * Co), acc_map),
        pl.BlockSpec((8, Cxo), acc_map),
        pl.BlockSpec((8, Cxo), acc_map),
    )
    su, squ, sx, sqx = pl.pallas_call(
        functools.partial(_stats_kernel, tpc=tpc, m1=M1, m2=M2),
        out_shape=(jax.ShapeDtypeStruct((8 * ncores, 4 * Co), jnp.float32),
                   jax.ShapeDtypeStruct((8 * ncores, 4 * Co), jnp.float32),
                   jax.ShapeDtypeStruct((8 * ncores, Cxo), jnp.float32),
                   jax.ShapeDtypeStruct((8 * ncores, Cxo), jnp.float32)),
        grid=(ncores, tpc),
        in_specs=stats_in_specs,
        out_specs=stats_out_specs,
        compiler_params=pltpu.CompilerParams(
            dimension_semantics=("parallel", "arbitrary"),   # 2 TCs on v7x, accumulate inside
            vmem_limit_bytes=vmem_limit),
        cost_estimate=pl.CostEstimate(
            flops=mm_flops + 6 * act_elems,
            transcendentals=0,
            bytes_accessed=in_bytes_total + 2 * 8 * ncores * (4 * Co + Cxo) * 4),
    )(up_flat, x_flat, wtr_mat, btr4, wx_mat, bx)

    # ---- fold cores / sublanes / taps; compute scale & shift (tiny XLA glue) --
    eps = jnp.float32(1e-5)
    count = jnp.float32(M2)                 # N*H*W elements per BN channel
    sum_up = su.reshape(-1, 4, Co).sum(axis=(0, 1))
    sumsq_up = squ.reshape(-1, 4, Co).sum(axis=(0, 1))
    sum_x = sx.sum(axis=0)
    sumsq_x = sqx.sum(axis=0)
    mean_up = sum_up / count
    var_up = jnp.maximum(sumsq_up / count - mean_up * mean_up, 0.0)
    mean_x = sum_x / count
    var_x = jnp.maximum(sumsq_x / count - mean_x * mean_x, 0.0)

    gamma_up, gamma_x = gamma[:Co], gamma[Co:]
    beta_up, beta_x = beta[:Co], beta[Co:]
    scale_up = gamma_up * jax.lax.rsqrt(var_up + eps)
    shift_up = beta_up - mean_up * scale_up
    scale_x = gamma_x * jax.lax.rsqrt(var_x + eps)
    shift_x = beta_x - mean_x * scale_x

    scale4 = jnp.tile(scale_up, 4)[None, :].astype(jnp.float32)    # (1, 4*Co)
    shift4 = jnp.tile(shift_up, 4)[None, :].astype(jnp.float32)
    scale_x = scale_x[None, :].astype(jnp.float32)                 # (1, Cxo)
    shift_x = shift_x[None, :].astype(jnp.float32)

    # ------------------------------ pass 2: apply -----------------------------
    const1 = lambda i: (0, 0)
    apply_in_specs = [
        pl.BlockSpec((tm, Cu), lambda i: (i, 0)),
        pl.BlockSpec((4 * tm, Cx), lambda i: (i, 0)),
        pl.BlockSpec((Cu, 4 * Co), const1),
        pl.BlockSpec((1, 4 * Co), const1),
        pl.BlockSpec((Cx, Cxo), const1),
        pl.BlockSpec((1, Cxo), const1),
        pl.BlockSpec((1, 4 * Co), const1),
        pl.BlockSpec((1, 4 * Co), const1),
        pl.BlockSpec((1, Cxo), const1),
        pl.BlockSpec((1, Cxo), const1),
    ]
    apply_out_specs = (
        pl.BlockSpec((tm, 4 * Co), lambda i: (i, 0)),
        pl.BlockSpec((4 * tm, Cxo), lambda i: (i, 0)),
    )
    out_up, out_x = pl.pallas_call(
        _apply_kernel,
        out_shape=(jax.ShapeDtypeStruct((M1, 4 * Co), compute_dtype),
                   jax.ShapeDtypeStruct((M2, Cxo), compute_dtype)),
        grid=(n_tiles,),
        in_specs=apply_in_specs,
        out_specs=apply_out_specs,
        compiler_params=pltpu.CompilerParams(
            dimension_semantics=("parallel",),       # independent tiles -> 2 TCs on v7x
            vmem_limit_bytes=vmem_limit),
        cost_estimate=pl.CostEstimate(
            flops=mm_flops + 4 * act_elems,
            transcendentals=0,
            bytes_accessed=in_bytes_total + act_elems * out_bytes),
    )(up_flat, x_flat, wtr_mat, btr4, wx_mat, bx, scale4, shift4, scale_x, shift_x)

    # ---- layout glue back (kept in compute_dtype; NHWC avoids the last transpose)
    up_nhwc = out_up.reshape(N, Hu, Wu, 2, 2, Co)                  # (n,hu,wu,di,dj,co)
    up_nhwc = jnp.transpose(up_nhwc, (0, 1, 3, 2, 4, 5)).reshape(N, H, W, Co)
    x_nhwc = out_x.reshape(N, H, W, Cxo)
    cat = jnp.concatenate([up_nhwc, x_nhwc], axis=-1)              # (N, H, W, n_out)
    if out_layout == "NHWC":
        return cat
    return jnp.transpose(cat, (0, 3, 1, 2))                        # NCHW


def reference_forward(up_p, x_p, w_tr, b_tr, w_x, b_x, gamma, beta):
    """Plain-JAX mirror of the PyTorch module (NCHW), for verification."""
    N, Cu, Hu, Wu = up_p.shape
    Co = w_tr.shape[1]
    y = jnp.einsum('nchw,coij->nohiwj', up_p, w_tr)
    up = y.reshape(N, Co, 2 * Hu, 2 * Wu) + b_tr[None, :, None, None]
    xo = jnp.einsum('nchw,oc->nohw', x_p, w_x[:, :, 0, 0]) + b_x[None, :, None, None]
    cat = jnp.concatenate([up, xo], axis=1)
    r = jnp.maximum(cat, 0.0)
    mean = jnp.mean(r, axis=(0, 2, 3), keepdims=True)
    var = jnp.var(r, axis=(0, 2, 3), keepdims=True)                # biased, like BN
    return ((r - mean) / jnp.sqrt(var + 1e-5)
            * gamma[None, :, None, None] + beta[None, :, None, None])


if __name__ == "__main__":
    # Small shapes: up_in=4, x_in=4, n_out=8 -> up_out = x_out = 4
    N, up_in, x_in, n_out = 2, 4, 4, 8
    up_out = x_out = n_out // 2
    Hu = Wu = 8
    H = W = 2 * Hu

    key = jax.random.PRNGKey(0)
    ks = jax.random.split(key, 8)
    up_p = jax.random.normal(ks[0], (N, up_in, Hu, Wu), jnp.float32)
    x_p = jax.random.normal(ks[1], (N, x_in, H, W), jnp.float32)
    w_tr = 0.1 * jax.random.normal(ks[2], (up_in, up_out, 2, 2), jnp.float32)
    b_tr = 0.1 * jax.random.normal(ks[3], (up_out,), jnp.float32)
    w_x = 0.1 * jax.random.normal(ks[4], (x_out, x_in, 1, 1), jnp.float32)
    b_x = 0.1 * jax.random.normal(ks[5], (x_out,), jnp.float32)
    gamma = 1.0 + 0.1 * jax.random.normal(ks[6], (n_out,), jnp.float32)
    beta = 0.1 * jax.random.normal(ks[7], (n_out,), jnp.float32)

    ref = reference_forward(up_p, x_p, w_tr, b_tr, w_x, b_x, gamma, beta)

    # fp32, forced multi-tile grid with a ragged tail and an odd tile count
    # (M1=128, tm=48 -> tiles 48/48/32, split 2/2 across the parallel axis with
    # one clamped duplicate tile) to exercise accumulator + masking paths.
    out = unet_block_forward(up_p, x_p, w_tr, b_tr, w_x, b_x, gamma, beta, tm=48)
    out = jax.block_until_ready(out)
    assert out.shape == (N, n_out, H, W), out.shape
    assert jnp.allclose(out, ref, atol=1e-4, rtol=1e-4), \
        float(jnp.max(jnp.abs(out - ref)))

    # Auto (VMEM-budgeted, generation-dependent) tile size.
    out2 = jax.block_until_ready(
        unet_block_forward(up_p, x_p, w_tr, b_tr, w_x, b_x, gamma, beta))
    assert jnp.allclose(out2, ref, atol=1e-4, rtol=1e-4)

    # NHWC output path (skips the final NHWC->NCHW transpose).
    out_nhwc = jax.block_until_ready(
        unet_block_forward(up_p, x_p, w_tr, b_tr, w_x, b_x, gamma, beta,
                           tm=48, out_layout="NHWC"))
    assert jnp.allclose(out_nhwc, jnp.transpose(ref, (0, 2, 3, 1)),
                        atol=1e-4, rtol=1e-4)

    # bf16 compute + bf16 output path (halves HBM traffic on realistic shapes);
    # loose tolerance since outputs are unit-variance normalized and now bf16.
    out_bf16 = jax.block_until_ready(
        unet_block_forward(up_p, x_p, w_tr, b_tr, w_x, b_x, gamma, beta,
                           tm=48, compute_dtype=jnp.bfloat16))
    assert out_bf16.dtype == jnp.bfloat16
    assert float(jnp.max(jnp.abs(out_bf16.astype(jnp.float32) - ref))) < 0.15

    print("KERNEL_OK")
</pallas_src>

<mosaic_0001>
module attributes {stable_mosaic.version = 11 : i64} {
  func.func @_stats_kernel(%arg0: i32, %arg1: i32, %arg2: memref<48x4xf32, #tpu.memory_space<vmem>>, %arg3: memref<192x4xf32, #tpu.memory_space<vmem>>, %arg4: memref<4x16xf32, #tpu.memory_space<vmem>>, %arg5: memref<1x16xf32, #tpu.memory_space<vmem>>, %arg6: memref<4x4xf32, #tpu.memory_space<vmem>>, %arg7: memref<1x4xf32, #tpu.memory_space<vmem>>, %arg8: memref<8x16xf32, #tpu.memory_space<vmem>>, %arg9: memref<8x16xf32, #tpu.memory_space<vmem>>, %arg10: memref<8x4xf32, #tpu.memory_space<vmem>>, %arg11: memref<8x4xf32, #tpu.memory_space<vmem>>) attributes {dimension_semantics = [#tpu.dimension_semantics<parallel>, #tpu.dimension_semantics<arbitrary>], iteration_bounds = array<i64: 2, 2>, scalar_prefetch = 0 : i64, scratch_operands = 0 : i64, tpu.core_type = #tpu.core_type<tc>, window_params = [{transform_indices = @transform_0, window_bounds = array<i64: 48, 4>}, {transform_indices = @transform_1, window_bounds = array<i64: 192, 4>}, {pipeline_mode = #tpu.pipeline_mode<synchronous>, transform_indices = @transform_2, window_bounds = array<i64: 4, 16>}, {pipeline_mode = #tpu.pipeline_mode<synchronous>, transform_indices = @transform_3, window_bounds = array<i64: 1, 16>}, {pipeline_mode = #tpu.pipeline_mode<synchronous>, transform_indices = @transform_4, window_bounds = array<i64: 4, 4>}, {pipeline_mode = #tpu.pipeline_mode<synchronous>, transform_indices = @transform_5, window_bounds = array<i64: 1, 4>}, {transform_indices = @transform_6, window_bounds = array<i64: 8, 16>}, {transform_indices = @transform_7, window_bounds = array<i64: 8, 16>}, {transform_indices = @transform_8, window_bounds = array<i64: 8, 4>}, {transform_indices = @transform_9, window_bounds = array<i64: 8, 4>}]} {
    %c0_i32 = arith.constant 0 : i32
    %0 = arith.cmpi eq, %arg1, %c0_i32 : i32
    %1 = arith.extui %0 : i1 to i32
    %c0_i32_0 = arith.constant 0 : i32
    %2 = arith.cmpi ne, %1, %c0_i32_0 : i32
    scf.if %2 {
      %cst_17 = arith.constant 0.000000e+00 : f32
      %29 = vector.broadcast %cst_17 : f32 to vector<8x16xf32>
      %c0_18 = arith.constant 0 : index
      %c0_19 = arith.constant 0 : index
      %30 = vector.load %arg8[%c0_18, %c0_19] : memref<8x16xf32, #tpu.memory_space<vmem>>, vector<8x16xf32>
      tpu.vector_store %arg8[%c0_18, %c0_19], %29 {strides = array<i32>} : memref<8x16xf32, #tpu.memory_space<vmem>>, vector<8x16xf32>,
      %cst_20 = arith.constant 0.000000e+00 : f32
      %31 = vector.broadcast %cst_20 : f32 to vector<8x16xf32>
      %c0_21 = arith.constant 0 : index
      %c0_22 = arith.constant 0 : index
      %32 = vector.load %arg9[%c0_21, %c0_22] : memref<8x16xf32, #tpu.memory_space<vmem>>, vector<8x16xf32>
      tpu.vector_store %arg9[%c0_21, %c0_22], %31 {strides = array<i32>} : memref<8x16xf32, #tpu.memory_space<vmem>>, vector<8x16xf32>,
      %cst_23 = arith.constant 0.000000e+00 : f32
      %33 = vector.broadcast %cst_23 : f32 to vector<8x4xf32>
      %c0_24 = arith.constant 0 : index
      %c0_25 = arith.constant 0 : index
      %34 = vector.load %arg10[%c0_24, %c0_25] : memref<8x4xf32, #tpu.memory_space<vmem>>, vector<8x4xf32>
      tpu.vector_store %arg10[%c0_24, %c0_25], %33 {strides = array<i32>} : memref<8x4xf32, #tpu.memory_space<vmem>>, vector<8x4xf32>,
      %cst_26 = arith.constant 0.000000e+00 : f32
      %35 = vector.broadcast %cst_26 : f32 to vector<8x4xf32>
      %c0_27 = arith.constant 0 : index
      %c0_28 = arith.constant 0 : index
      %36 = vector.load %arg11[%c0_27, %c0_28] : memref<8x4xf32, #tpu.memory_space<vmem>>, vector<8x4xf32>
      tpu.vector_store %arg11[%c0_27, %c0_28], %35 {strides = array<i32>} : memref<8x4xf32, #tpu.memory_space<vmem>>, vector<8x4xf32>,
    } else {
    }
    %c2_i32 = arith.constant 2 : i32
    %3 = arith.muli %arg0, %c2_i32 : i32
    %4 = arith.addi %3, %arg1 : i32
    %c0 = arith.constant 0 : index
    %c0_1 = arith.constant 0 : index
    %5 = vector.load %arg2[%c0, %c0_1] : memref<48x4xf32, #tpu.memory_space<vmem>>, vector<48x4xf32>
    %c0_2 = arith.constant 0 : index
    %c0_3 = arith.constant 0 : index
    %6 = vector.load %arg4[%c0_2, %c0_3] : memref<4x16xf32, #tpu.memory_space<vmem>>, vector<4x16xf32>
    %cst = arith.constant dense<0.000000e+00> : vector<48x16xf32>
    %7 = tpu.matmul %5, %6, %cst {dimension_numbers = #tpu.dot_dimension_numbers<[1], [0], [0], [1], [0, 0, 1, 1], [], []>} : vector<48x4xf32>, vector<4x16xf32>, vector<48x16xf32> -> vector<48x16xf32>
    %c0_4 = arith.constant 0 : index
    %c0_5 = arith.constant 0 : index
    %8 = vector.load %arg5[%c0_4, %c0_5] : memref<1x16xf32, #tpu.memory_space<vmem>>, vector<1x16xf32>
    %9 = vector.broadcast %8 : vector<1x16xf32> to vector<48x16xf32>
    %10 = arith.addf %7, %9 : vector<48x16xf32>
    %cst_6 = arith.constant 0.000000e+00 : f32
    %11 = vector.broadcast %cst_6 : f32 to vector<48x16xf32>
    %12 = arith.maximumf %10, %11 : vector<48x16xf32>
    %c0_7 = arith.constant 0 : index
    %c0_8 = arith.constant 0 : index
    %13 = vector.load %arg3[%c0_7, %c0_8] : memref<192x4xf32, #tpu.memory_space<vmem>>, vector<192x4xf32>
    %c0_9 = arith.constant 0 : index
    %c0_10 = arith.constant 0 : index
    %14 = vector.load %arg6[%c0_9, %c0_10] : memref<4x4xf32, #tpu.memory_space<vmem>>, vector<4x4xf32>
    %cst_11 = arith.constant dense<0.000000e+00> : vector<192x4xf32>
    %15 = tpu.matmul %13, %14, %cst_11 {dimension_numbers = #tpu.dot_dimension_numbers<[1], [0], [0], [1], [0, 0, 1, 1], [], []>} : vector<192x4xf32>, vector<4x4xf32>, vector<192x4xf32> -> vector<192x4xf32>
    %c0_12 = arith.constant 0 : index
    %c0_13 = arith.constant 0 : index
    %16 = vector.load %arg7[%c0_12, %c0_13] : memref<1x4xf32, #tpu.memory_space<vmem>>, vector<1x4xf32>
    %17 = vector.broadcast %16 : vector<1x4xf32> to vector<192x4xf32>
    %18 = arith.addf %15, %17 : vector<192x4xf32>
    %cst_14 = arith.constant 0.000000e+00 : f32
    %19 = vector.broadcast %cst_14 : f32 to vector<192x4xf32>
    %20 = arith.maximumf %18, %19 : vector<192x4xf32>
    %c1_i32 = arith.constant 1 : i32
    %21 = arith.addi %4, %c1_i32 : i32
    %c48_i32 = arith.constant 48 : i32
    %22 = arith.muli %21, %c48_i32 : i32
    %c128_i32 = arith.constant 128 : i32
    %23 = arith.cmpi sle, %22, %c128_i32 : i32
    %24 = arith.extui %23 : i1 to i32
    %c0_i32_15 = arith.constant 0 : i32
    %25 = arith.cmpi ne, %24, %c0_i32_15 : i32
    scf.if %25 {
      %c0_17 = arith.constant 0 : index
      %c0_18 = arith.constant 0 : index
      %29 = vector.load %arg8[%c0_17, %c0_18] : memref<8x16xf32, #tpu.memory_space<vmem>>, vector<8x16xf32>
      %30 = vector.shape_cast %12 : vector<48x16xf32> to vector<6x8x16xf32>
      %cst_19 = arith.constant dense<0.000000e+00> : vector<8x16xf32>
      %31 = vector.multi_reduction <add>, %30, %cst_19 [0] : vector<6x8x16xf32> to vector<8x16xf32>
      %32 = arith.addf %29, %31 : vector<8x16xf32>
      %c0_20 = arith.constant 0 : index
      %c0_21 = arith.constant 0 : index
      %33 = vector.load %arg8[%c0_20, %c0_21] : memref<8x16xf32, #tpu.memory_space<vmem>>, vector<8x16xf32>
      tpu.vector_store %arg8[%c0_20, %c0_21], %32 {strides = array<i32>} : memref<8x16xf32, #tpu.memory_space<vmem>>, vector<8x16xf32>,
      %c0_22 = arith.constant 0 : index
      %c0_23 = arith.constant 0 : index
      %34 = vector.load %arg9[%c0_22, %c0_23] : memref<8x16xf32, #tpu.memory_space<vmem>>, vector<8x16xf32>
      %35 = arith.mulf %12, %12 : vector<48x16xf32>
      %36 = vector.shape_cast %35 : vector<48x16xf32> to vector<6x8x16xf32>
      %cst_24 = arith.constant dense<0.000000e+00> : vector<8x16xf32>
      %37 = vector.multi_reduction <add>, %36, %cst_24 [0] : vector<6x8x16xf32> to vector<8x16xf32>
      %38 = arith.addf %34, %37 : vector<8x16xf32>
      %c0_25 = arith.constant 0 : index
      %c0_26 = arith.constant 0 : index
      %39 = vector.load %arg9[%c0_25, %c0_26] : memref<8x16xf32, #tpu.memory_space<vmem>>, vector<8x16xf32>
      tpu.vector_store %arg9[%c0_25, %c0_26], %38 {strides = array<i32>} : memref<8x16xf32, #tpu.memory_space<vmem>>, vector<8x16xf32>,
      %c0_27 = arith.constant 0 : index
      %c0_28 = arith.constant 0 : index
      %40 = vector.load %arg10[%c0_27, %c0_28] : memref<8x4xf32, #tpu.memory_space<vmem>>, vector<8x4xf32>
      %41 = vector.shape_cast %20 : vector<192x4xf32> to vector<24x8x4xf32>
      %cst_29 = arith.constant dense<0.000000e+00> : vector<8x4xf32>
      %42 = vector.multi_reduction <add>, %41, %cst_29 [0] : vector<24x8x4xf32> to vector<8x4xf32>
      %43 = arith.addf %40, %42 : vector<8x4xf32>
      %c0_30 = arith.constant 0 : index
      %c0_31 = arith.constant 0 : index
      %44 = vector.load %arg10[%c0_30, %c0_31] : memref<8x4xf32, #tpu.memory_space<vmem>>, vector<8x4xf32>
      tpu.vector_store %arg10[%c0_30, %c0_31], %43 {strides = array<i32>} : memref<8x4xf32, #tpu.memory_space<vmem>>, vector<8x4xf32>,
      %c0_32 = arith.constant 0 : index
      %c0_33 = arith.constant 0 : index
      %45 = vector.load %arg11[%c0_32, %c0_33] : memref<8x4xf32, #tpu.memory_space<vmem>>, vector<8x4xf32>
      %46 = arith.mulf %20, %20 : vector<192x4xf32>
      %47 = vector.shape_cast %46 : vector<192x4xf32> to vector<24x8x4xf32>
      %cst_34 = arith.constant dense<0.000000e+00> : vector<8x4xf32>
      %48 = vector.multi_reduction <add>, %47, %cst_34 [0] : vector<24x8x4xf32> to vector<8x4xf32>
      %49 = arith.addf %45, %48 : vector<8x4xf32>
      %c0_35 = arith.constant 0 : index
      %c0_36 = arith.constant 0 : index
      %50 = vector.load %arg11[%c0_35, %c0_36] : memref<8x4xf32, #tpu.memory_space<vmem>>, vector<8x4xf32>
      tpu.vector_store %arg11[%c0_35, %c0_36], %49 {strides = array<i32>} : memref<8x4xf32, #tpu.memory_space<vmem>>, vector<8x4xf32>,
    } else {
    }
    %true = arith.constant true
    %26 = arith.xori %23, %true : i1
    %27 = arith.extui %26 : i1 to i32
    %c0_i32_16 = arith.constant 0 : i32
    %28 = arith.cmpi ne, %27, %c0_i32_16 : i32
    scf.if %28 {
      %c48_i32_17 = arith.constant 48 : i32
      %29 = arith.muli %4, %c48_i32_17 : i32
      %30 = tpu.iota {dimensions = array<i32: 0>} : vector<48x1xi32>
      %31 = vector.broadcast %29 : i32 to vector<48x1xi32>
      %32 = arith.addi %31, %30 : vector<48x1xi32>
      %c192_i32 = arith.constant 192 : i32
      %33 = arith.muli %4, %c192_i32 : i32
      %34 = tpu.iota {dimensions = array<i32: 0>} : vector<192x1xi32>
      %35 = vector.broadcast %33 : i32 to vector<192x1xi32>
      %36 = arith.addi %35, %34 : vector<192x1xi32>
      %c128_i32_18 = arith.constant 128 : i32
      %37 = vector.broadcast %c128_i32_18 : i32 to vector<48x1xi32>
      %38 = arith.cmpi slt, %32, %37 : vector<48x1xi32>
      %cst_19 = arith.constant 0.000000e+00 : f32
      %39 = vector.shape_cast %38 : vector<48x1xi1> to vector<48x1xi1>
      %40 = vector.broadcast %39 : vector<48x1xi1> to vector<48x16xi1>
      %41 = vector.broadcast %cst_19 : f32 to vector<48x16xf32>
      %42 = arith.select %40, %12, %41 : vector<48x16xi1>, vector<48x16xf32>
      %c512_i32 = arith.constant 512 : i32
      %43 = vector.broadcast %c512_i32 : i32 to vector<192x1xi32>
      %44 = arith.cmpi slt, %36, %43 : vector<192x1xi32>
      %cst_20 = arith.constant 0.000000e+00 : f32
      %45 = vector.shape_cast %44 : vector<192x1xi1> to vector<192x1xi1>
      %46 = vector.broadcast %45 : vector<192x1xi1> to vector<192x4xi1>
      %47 = vector.broadcast %cst_20 : f32 to vector<192x4xf32>
      %48 = arith.select %46, %20, %47 : vector<192x4xi1>, vector<192x4xf32>
      %c0_21 = arith.constant 0 : index
      %c0_22 = arith.constant 0 : index
      %49 = vector.load %arg8[%c0_21, %c0_22] : memref<8x16xf32, #tpu.memory_space<vmem>>, vector<8x16xf32>
      %50 = vector.shape_cast %42 : vector<48x16xf32> to vector<6x8x16xf32>
      %cst_23 = arith.constant dense<0.000000e+00> : vector<8x16xf32>
      %51 = vector.multi_reduction <add>, %50, %cst_23 [0] : vector<6x8x16xf32> to vector<8x16xf32>
      %52 = arith.addf %49, %51 : vector<8x16xf32>
      %c0_24 = arith.constant 0 : index
      %c0_25 = arith.constant 0 : index
      %53 = vector.load %arg8[%c0_24, %c0_25] : memref<8x16xf32, #tpu.memory_space<vmem>>, vector<8x16xf32>
      tpu.vector_store %arg8[%c0_24, %c0_25], %52 {strides = array<i32>} : memref<8x16xf32, #tpu.memory_space<vmem>>, vector<8x16xf32>,
      %c0_26 = arith.constant 0 : index
      %c0_27 = arith.constant 0 : index
      %54 = vector.load %arg9[%c0_26, %c0_27] : memref<8x16xf32, #tpu.memory_space<vmem>>, vector<8x16xf32>
      %55 = arith.mulf %42, %42 : vector<48x16xf32>
      %56 = vector.shape_cast %55 : vector<48x16xf32> to vector<6x8x16xf32>
      %cst_28 = arith.constant dense<0.000000e+00> : vector<8x16xf32>
      %57 = vector.multi_reduction <add>, %56, %cst_28 [0] : vector<6x8x16xf32> to vector<8x16xf32>
      %58 = arith.addf %54, %57 : vector<8x16xf32>
      %c0_29 = arith.constant 0 : index
      %c0_30 = arith.constant 0 : index
      %59 = vector.load %arg9[%c0_29, %c0_30] : memref<8x16xf32, #tpu.memory_space<vmem>>, vector<8x16xf32>
      tpu.vector_store %arg9[%c0_29, %c0_30], %58 {strides = array<i32>} : memref<8x16xf32, #tpu.memory_space<vmem>>, vector<8x16xf32>,
      %c0_31 = arith.constant 0 : index
      %c0_32 = arith.constant 0 : index
      %60 = vector.load %arg10[%c0_31, %c0_32] : memref<8x4xf32, #tpu.memory_space<vmem>>, vector<8x4xf32>
      %61 = vector.shape_cast %48 : vector<192x4xf32> to vector<24x8x4xf32>
      %cst_33 = arith.constant dense<0.000000e+00> : vector<8x4xf32>
      %62 = vector.multi_reduction <add>, %61, %cst_33 [0] : vector<24x8x4xf32> to vector<8x4xf32>
      %63 = arith.addf %60, %62 : vector<8x4xf32>
      %c0_34 = arith.constant 0 : index
      %c0_35 = arith.constant 0 : index
      %64 = vector.load %arg10[%c0_34, %c0_35] : memref<8x4xf32, #tpu.memory_space<vmem>>, vector<8x4xf32>
      tpu.vector_store %arg10[%c0_34, %c0_35], %63 {strides = array<i32>} : memref<8x4xf32, #tpu.memory_space<vmem>>, vector<8x4xf32>,
      %c0_36 = arith.constant 0 : index
      %c0_37 = arith.constant 0 : index
      %65 = vector.load %arg11[%c0_36, %c0_37] : memref<8x4xf32, #tpu.memory_space<vmem>>, vector<8x4xf32>
      %66 = arith.mulf %48, %48 : vector<192x4xf32>
      %67 = vector.shape_cast %66 : vector<192x4xf32> to vector<24x8x4xf32>
      %cst_38 = arith.constant dense<0.000000e+00> : vector<8x4xf32>
      %68 = vector.multi_reduction <add>, %67, %cst_38 [0] : vector<24x8x4xf32> to vector<8x4xf32>
      %69 = arith.addf %65, %68 : vector<8x4xf32>
      %c0_39 = arith.constant 0 : index
      %c0_40 = arith.constant 0 : index
      %70 = vector.load %arg11[%c0_39, %c0_40] : memref<8x4xf32, #tpu.memory_space<vmem>>, vector<8x4xf32>
      tpu.vector_store %arg11[%c0_39, %c0_40], %69 {strides = array<i32>} : memref<8x4xf32, #tpu.memory_space<vmem>>, vector<8x4xf32>,
    } else {
    }
    return
  }
  func.func @transform_0(%arg0: i32, %arg1: i32) -> (i32, i32) {
    %c2_i32 = arith.constant 2 : i32
    %0 = arith.muli %arg0, %c2_i32 : i32
    %1 = arith.addi %0, %arg1 : i32
    %c2_i32_0 = arith.constant 2 : i32
    %2 = arith.minsi %1, %c2_i32_0 : i32
    %c0_i32 = arith.constant 0 : i32
    %c0_i32_1 = arith.constant 0 : i32
    return %2, %c0_i32 : i32, i32
  }
  func.func @transform_1(%arg0: i32, %arg1: i32) -> (i32, i32) {
    %c2_i32 = arith.constant 2 : i32
    %0 = arith.muli %arg0, %c2_i32 : i32
    %1 = arith.addi %0, %arg1 : i32
    %c2_i32_0 = arith.constant 2 : i32
    %2 = arith.minsi %1, %c2_i32_0 : i32
    %c0_i32 = arith.constant 0 : i32
    %c0_i32_1 = arith.constant 0 : i32
    return %2, %c0_i32 : i32, i32
  }
  func.func @transform_2(%arg0: i32, %arg1: i32) -> (i32, i32) {
    %c0_i32 = arith.constant 0 : i32
    %c0_i32_0 = arith.constant 0 : i32
    %c0_i32_1 = arith.constant 0 : i32
    return %c0_i32, %c0_i32_0 : i32, i32
  }
  func.func @transform_3(%arg0: i32, %arg1: i32) -> (i32, i32) {
    %c0_i32 = arith.constant 0 : i32
    %c0_i32_0 = arith.constant 0 : i32
    %c0_i32_1 = arith.constant 0 : i32
    return %c0_i32, %c0_i32_0 : i32, i32
  }
  func.func @transform_4(%arg0: i32, %arg1: i32) -> (i32, i32) {
    %c0_i32 = arith.constant 0 : i32
    %c0_i32_0 = arith.constant 0 : i32
    %c0_i32_1 = arith.constant 0 : i32
    return %c0_i32, %c0_i32_0 : i32, i32
  }
  func.func @transform_5(%arg0: i32, %arg1: i32) -> (i32, i32) {
    %c0_i32 = arith.constant 0 : i32
    %c0_i32_0 = arith.constant 0 : i32
    %c0_i32_1 = arith.constant 0 : i32
    return %c0_i32, %c0_i32_0 : i32, i32
  }
  func.func @transform_6(%arg0: i32, %arg1: i32) -> (i32, i32) {
    %c0_i32 = arith.constant 0 : i32
    %c0_i32_0 = arith.constant 0 : i32
    return %arg0, %c0_i32 : i32, i32
  }
  func.func @transform_7(%arg0: i32, %arg1: i32) -> (i32, i32) {
    %c0_i32 = arith.constant 0 : i32
    %c0_i32_0 = arith.constant 0 : i32
    return %arg0, %c0_i32 : i32, i32
  }
  func.func @transform_8(%arg0: i32, %arg1: i32) -> (i32, i32) {
    %c0_i32 = arith.constant 0 : i32
    %c0_i32_0 = arith.constant 0 : i32
    return %arg0, %c0_i32 : i32, i32
  }
  func.func @transform_9(%arg0: i32, %arg1: i32) -> (i32, i32) {
    %c0_i32 = arith.constant 0 : i32
    %c0_i32_0 = arith.constant 0 : i32
    return %arg0, %c0_i32 : i32, i32
  }
}

module attributes {stable_mosaic.version = 11 : i64} {
  func.func @_apply_kernel(%arg0: i32, %arg1: memref<48x4xf32, #tpu.memory_space<vmem>>, %arg2: memref<192x4xf32, #tpu.memory_space<vmem>>, %arg3: memref<4x16xf32, #tpu.memory_space<vmem>>, %arg4: memref<1x16xf32, #tpu.memory_space<vmem>>, %arg5: memref<4x4xf32, #tpu.memory_space<vmem>>, %arg6: memref<1x4xf32, #tpu.memory_space<vmem>>, %arg7: memref<1x16xf32, #tpu.memory_space<vmem>>, %arg8: memref<1x16xf32, #tpu.memory_space<vmem>>, %arg9: memref<1x4xf32, #tpu.memory_space<vmem>>, %arg10: memref<1x4xf32, #tpu.memory_space<vmem>>, %arg11: memref<48x16xf32, #tpu.memory_space<vmem>>, %arg12: memref<192x4xf32, #tpu.memory_space<vmem>>) attributes {dimension_semantics = [#tpu.dimension_semantics<parallel>], iteration_bounds = array<i64: 3>, scalar_prefetch = 0 : i64, scratch_operands = 0 : i64, tpu.core_type = #tpu.core_type<tc>, window_params = [{transform_indices = @transform_0, window_bounds = array<i64: 48, 4>}, {transform_indices = @transform_1, window_bounds = array<i64: 192, 4>}, {pipeline_mode = #tpu.pipeline_mode<synchronous>, transform_indices = @transform_2, window_bounds = array<i64: 4, 16>}, {pipeline_mode = #tpu.pipeline_mode<synchronous>, transform_indices = @transform_3, window_bounds = array<i64: 1, 16>}, {pipeline_mode = #tpu.pipeline_mode<synchronous>, transform_indices = @transform_4, window_bounds = array<i64: 4, 4>}, {pipeline_mode = #tpu.pipeline_mode<synchronous>, transform_indices = @transform_5, window_bounds = array<i64: 1, 4>}, {pipeline_mode = #tpu.pipeline_mode<synchronous>, transform_indices = @transform_6, window_bounds = array<i64: 1, 16>}, {pipeline_mode = #tpu.pipeline_mode<synchronous>, transform_indices = @transform_7, window_bounds = array<i64: 1, 16>}, {pipeline_mode = #tpu.pipeline_mode<synchronous>, transform_indices = @transform_8, window_bounds = array<i64: 1, 4>}, {pipeline_mode = #tpu.pipeline_mode<synchronous>, transform_indices = @transform_9, window_bounds = array<i64: 1, 4>}, {transform_indices = @transform_10, window_bounds = array<i64: 48, 16>}, {transform_indices = @transform_11, window_bounds = array<i64: 192, 4>}]} {
    %c0 = arith.constant 0 : index
    %c0_0 = arith.constant 0 : index
    %0 = vector.load %arg1[%c0, %c0_0] : memref<48x4xf32, #tpu.memory_space<vmem>>, vector<48x4xf32>
    %c0_1 = arith.constant 0 : index
    %c0_2 = arith.constant 0 : index
    %1 = vector.load %arg3[%c0_1, %c0_2] : memref<4x16xf32, #tpu.memory_space<vmem>>, vector<4x16xf32>
    %cst = arith.constant dense<0.000000e+00> : vector<48x16xf32>
    %2 = tpu.matmul %0, %1, %cst {dimension_numbers = #tpu.dot_dimension_numbers<[1], [0], [0], [1], [0, 0, 1, 1], [], []>} : vector<48x4xf32>, vector<4x16xf32>, vector<48x16xf32> -> vector<48x16xf32>
    %c0_3 = arith.constant 0 : index
    %c0_4 = arith.constant 0 : index
    %3 = vector.load %arg4[%c0_3, %c0_4] : memref<1x16xf32, #tpu.memory_space<vmem>>, vector<1x16xf32>
    %4 = vector.broadcast %3 : vector<1x16xf32> to vector<48x16xf32>
    %5 = arith.addf %2, %4 : vector<48x16xf32>
    %cst_5 = arith.constant 0.000000e+00 : f32
    %6 = vector.broadcast %cst_5 : f32 to vector<48x16xf32>
    %7 = arith.maximumf %5, %6 : vector<48x16xf32>
    %c0_6 = arith.constant 0 : index
    %c0_7 = arith.constant 0 : index
    %8 = vector.load %arg7[%c0_6, %c0_7] : memref<1x16xf32, #tpu.memory_space<vmem>>, vector<1x16xf32>
    %9 = vector.broadcast %8 : vector<1x16xf32> to vector<48x16xf32>
    %10 = arith.mulf %7, %9 : vector<48x16xf32>
    %c0_8 = arith.constant 0 : index
    %c0_9 = arith.constant 0 : index
    %11 = vector.load %arg8[%c0_8, %c0_9] : memref<1x16xf32, #tpu.memory_space<vmem>>, vector<1x16xf32>
    %12 = vector.broadcast %11 : vector<1x16xf32> to vector<48x16xf32>
    %13 = arith.addf %10, %12 : vector<48x16xf32>
    %c0_10 = arith.constant 0 : index
    %c0_11 = arith.constant 0 : index
    %14 = vector.load %arg11[%c0_10, %c0_11] : memref<48x16xf32, #tpu.memory_space<vmem>>, vector<48x16xf32>
    tpu.vector_store %arg11[%c0_10, %c0_11], %13 {strides = array<i32>} : memref<48x16xf32, #tpu.memory_space<vmem>>, vector<48x16xf32>,
    %c0_12 = arith.constant 0 : index
    %c0_13 = arith.constant 0 : index
    %15 = vector.load %arg2[%c0_12, %c0_13] : memref<192x4xf32, #tpu.memory_space<vmem>>, vector<192x4xf32>
    %c0_14 = arith.constant 0 : index
    %c0_15 = arith.constant 0 : index
    %16 = vector.load %arg5[%c0_14, %c0_15] : memref<4x4xf32, #tpu.memory_space<vmem>>, vector<4x4xf32>
    %cst_16 = arith.constant dense<0.000000e+00> : vector<192x4xf32>
    %17 = tpu.matmul %15, %16, %cst_16 {dimension_numbers = #tpu.dot_dimension_numbers<[1], [0], [0], [1], [0, 0, 1, 1], [], []>} : vector<192x4xf32>, vector<4x4xf32>, vector<192x4xf32> -> vector<192x4xf32>
    %c0_17 = arith.constant 0 : index
    %c0_18 = arith.constant 0 : index
    %18 = vector.load %arg6[%c0_17, %c0_18] : memref<1x4xf32, #tpu.memory_space<vmem>>, vector<1x4xf32>
    %19 = vector.broadcast %18 : vector<1x4xf32> to vector<192x4xf32>
    %20 = arith.addf %17, %19 : vector<192x4xf32>
    %cst_19 = arith.constant 0.000000e+00 : f32
    %21 = vector.broadcast %cst_19 : f32 to vector<192x4xf32>
    %22 = arith.maximumf %20, %21 : vector<192x4xf32>
    %c0_20 = arith.constant 0 : index
    %c0_21 = arith.constant 0 : index
    %23 = vector.load %arg9[%c0_20, %c0_21] : memref<1x4xf32, #tpu.memory_space<vmem>>, vector<1x4xf32>
    %24 = vector.broadcast %23 : vector<1x4xf32> to vector<192x4xf32>
    %25 = arith.mulf %22, %24 : vector<192x4xf32>
    %c0_22 = arith.constant 0 : index
    %c0_23 = arith.constant 0 : index
    %26 = vector.load %arg10[%c0_22, %c0_23] : memref<1x4xf32, #tpu.memory_space<vmem>>, vector<1x4xf32>
    %27 = vector.broadcast %26 : vector<1x4xf32> to vector<192x4xf32>
    %28 = arith.addf %25, %27 : vector<192x4xf32>
    %c0_24 = arith.constant 0 : index
    %c0_25 = arith.constant 0 : index
    %29 = vector.load %arg12[%c0_24, %c0_25] : memref<192x4xf32, #tpu.memory_space<vmem>>, vector<192x4xf32>
    tpu.vector_store %arg12[%c0_24, %c0_25], %28 {strides = array<i32>} : memref<192x4xf32, #tpu.memory_space<vmem>>, vector<192x4xf32>,
    return
  }
  func.func @transform_0(%arg0: i32) -> (i32, i32) {
    %c0_i32 = arith.constant 0 : i32
    %c0_i32_0 = arith.constant 0 : i32
    return %arg0, %c0_i32 : i32, i32
  }
  func.func @transform_1(%arg0: i32) -> (i32, i32) {
    %c0_i32 = arith.constant 0 : i32
    %c0_i32_0 = arith.constant 0 : i32
    return %arg0, %c0_i32 : i32, i32
  }
  func.func @transform_2(%arg0: i32) -> (i32, i32) {
    %c0_i32 = arith.constant 0 : i32
    %c0_i32_0 = arith.constant 0 : i32
    %c0_i32_1 = arith.constant 0 : i32
    return %c0_i32, %c0_i32_0 : i32, i32
  }
  func.func @transform_3(%arg0: i32) -> (i32, i32) {
    %c0_i32 = arith.constant 0 : i32
    %c0_i32_0 = arith.constant 0 : i32
    %c0_i32_1 = arith.constant 0 : i32
    return %c0_i32, %c0_i32_0 : i32, i32
  }
  func.func @transform_4(%arg0: i32) -> (i32, i32) {
    %c0_i32 = arith.constant 0 : i32
    %c0_i32_0 = arith.constant 0 : i32
    %c0_i32_1 = arith.constant 0 : i32
    return %c0_i32, %c0_i32_0 : i32, i32
  }
  func.func @transform_5(%arg0: i32) -> (i32, i32) {
    %c0_i32 = arith.constant 0 : i32
    %c0_i32_0 = arith.constant 0 : i32
    %c0_i32_1 = arith.constant 0 : i32
    return %c0_i32, %c0_i32_0 : i32, i32
  }
  func.func @transform_6(%arg0: i32) -> (i32, i32) {
    %c0_i32 = arith.constant 0 : i32
    %c0_i32_0 = arith.constant 0 : i32
    %c0_i32_1 = arith.constant 0 : i32
    return %c0_i32, %c0_i32_0 : i32, i32
  }
  func.func @transform_7(%arg0: i32) -> (i32, i32) {
    %c0_i32 = arith.constant 0 : i32
    %c0_i32_0 = arith.constant 0 : i32
    %c0_i32_1 = arith.constant 0 : i32
    return %c0_i32, %c0_i32_0 : i32, i32
  }
  func.func @transform_8(%arg0: i32) -> (i32, i32) {
    %c0_i32 = arith.constant 0 : i32
    %c0_i32_0 = arith.constant 0 : i32
    %c0_i32_1 = arith.constant 0 : i32
    return %c0_i32, %c0_i32_0 : i32, i32
  }
  func.func @transform_9(%arg0: i32) -> (i32, i32) {
    %c0_i32 = arith.constant 0 : i32
    %c0_i32_0 = arith.constant 0 : i32
    %c0_i32_1 = arith.constant 0 : i32
    return %c0_i32, %c0_i32_0 : i32, i32
  }
  func.func @transform_10(%arg0: i32) -> (i32, i32) {
    %c0_i32 = arith.constant 0 : i32
    %c0_i32_0 = arith.constant 0 : i32
    return %arg0, %c0_i32 : i32, i32
  }
  func.func @transform_11(%arg0: i32) -> (i32, i32) {
    %c0_i32 = arith.constant 0 : i32
    %c0_i32_0 = arith.constant 0 : i32
    return %arg0, %c0_i32 : i32, i32
  }
}

</mosaic_0001>

<bundles_post_ra>
// kernel: tile.19
= control target key start
LH: loop header
LB: loop body
LE: loop exit
PB: predicated region body
PF: predicated region fallthrough
CT: control target
= control target key end

     0   :  { %vm7_vm0 = vcmask 31744   ;;  %s37_s8 = smov 4   ;;  %s38_s9 = smov 8   ;;  %vm13_vm1 = vcmask 130144   ;;  %vm19_vm2 = vcmask 97344   ;;  %vm25_vm3 = vcmask 64544   ;;  %s55_s0 = inlined_call_operand.vmem [shape: f32[4,4], index: 0, kind: input, shape index: {}]   ;;  %s56_s1 = inlined_call_operand.vmem [shape: f32[1,16], index: 1, kind: output, shape index: {}]  }
   0x1   :  { %v4_v0 = vld [vmem:[%s55_s0] sm:$0xf]  ;;  %s36_s0 = smov 12  }
   0x2   :  { %5 = vst [vmem:[#allocation1] sm:$0xf] %v4_v0 }
   0x9   :  { %v10_v1 = vld [vmem:[#allocation1 + $0x3] sm:$0x1]   ;;  %v22_v2 = vld [vmem:[#allocation1 + $0x1] sm:$0x1]   ;;  %v6_v3 = vld [vmem:[#allocation1] sm:$0x1]  }
   0xa   :  { %11 = vrot.lane.b32.xlu0 %v10_v1, %s36_s0  ;;  %23 = vrot.lane.b32.xlu1 %v22_v2, %s37_s8  ;;  %v16_v4 = vld [vmem:[#allocation1 + $0x2] sm:$0x1]   ;;  %8 = vst.msk [vmem:[#allocation0] sm:$0x1] %vm7_vm0, %v6_v3  }
   0xe   :  { %17 = vrot.lane.b32.xlu0 %v16_v4, %s38_s9 }
  0x7c   :  { %v12_v5 = vpop.permute.xlu0 %11   ;;  %v24_v6 = vpop.permute.xlu1 %23  }
  0x7d   :  { %14 = vst.msk [vmem:[#allocation0] sm:$0x1] %vm13_vm1, %v12_v5  }
  0x80   :  { %v18_v7 = vpop.permute.xlu0 %17  }
  0x81   :  { %20 = vst.msk [vmem:[#allocation0] sm:$0x1] %vm19_vm2, %v18_v7  }
  0x82   :  { %26 = vst.msk [vmem:[#allocation0] sm:$0x1] %vm25_vm3, %v24_v6  }
  0x89   :  { %v30_v8 = vld [vmem:[#allocation0] sm:$0x1] }
  0x8a   :  { %32 = vst [vmem:[%s56_s1] sm:$0x1] %v30_v8 }

// kernel: tile.18
= control target key start
LH: loop header
LB: loop body
LE: loop exit
PB: predicated region body
PF: predicated region fallthrough
CT: control target
= control target key end

     0   :  { %s22_s0 = inlined_call_operand.vmem [shape: f32[4], index: 0, kind: input, shape index: {}]   ;;  %s23_s1 = inlined_call_operand.vmem [shape: f32[4,4], index: 1, kind: output, shape index: {}]  }
   0x1   :  { %v4_v0 = vld [vmem:[%s22_s0] ss:$0 sm:$0xff] }
   0x2   :  { %5 = vst [vmem:[%s23_s1] sm:$0xf] %v4_v0 }

// kernel: unet_block_forward.3
= control target key start
LH: loop header
LB: loop body
LE: loop exit
PB: predicated region body
PF: predicated region fallthrough
CT: control target
= control target key end

     0   :  { %s2554_s0 = inlined_call_operand.vmem [shape: f32[128,4], index: 0, kind: input, shape index: {}]   ;;  %s2555_s1 = inlined_call_operand.vmem [shape: f32[512,4], index: 1, kind: input, shape index: {}]   ;;  %s2556_s2 = inlined_call_operand.vmem [shape: f32[4,16], index: 2, kind: input, shape index: {}]   ;;  %s2557_s3 = inlined_call_operand.vmem [shape: f32[1,16], index: 3, kind: input, shape index: {}]   ;;  %s2558_s4 = inlined_call_operand.vmem [shape: f32[4,4], index: 4, kind: input, shape index: {}]   ;;  %s2559_s5 = inlined_call_operand.vmem [shape: f32[1,4], index: 5, kind: input, shape index: {}]   ;;  %s2560_s6 = inlined_call_operand.vmem [shape: f32[1,16], index: 6, kind: input, shape index: {}]   ;;  %s2561_s7 = inlined_call_operand.vmem [shape: f32[1,16], index: 7, kind: input, shape index: {}]   ;;  %s2562_s8 = inlined_call_operand.vmem [shape: f32[1,4], index: 8, kind: input, shape index: {}]   ;;  %s2563_s9 = inlined_call_operand.vmem [shape: f32[1,4], index: 9, kind: input, shape index: {}]   ;;  %s2564_s10 = inlined_call_operand.vmem [shape: f32[128,16], index: 10, kind: output, shape index: {0}]   ;;  %s2565_s11 = inlined_call_operand.vmem [shape: f32[512,4], index: 11, kind: output, shape index: {1}]  }
   0x1   :  { %2566 = sst [smem:[#allocation4_spill]] %s2554_s0 }
   0x2   :  { %2567 = sst [smem:[#allocation5_spill]] %s2555_s1 }
   0x3   :  { %2568 = sst [smem:[#allocation6_spill]] %s2556_s2 }
   0x4   :  { %2569 = sst [smem:[#allocation7_spill]] %s2557_s3 }
   0x5   :  { %2570 = sst [smem:[#allocation8_spill]] %s2558_s4 }
   0x6   :  { %s2097_s17 = smov 0   ;;  %s2099_s18 = smov 0  }
   0x7   :  { %s2101_s19 = smov 0  }
   0x8 LB: > { %s2110_s20 = sadd.s32 4294967295, %s1971_s19   ;;  %s2112_s21 = sadd.s32 1, %s1971_s19   ;;  %s1971_s19 = sphi %s2101_s19, %s2586_s19   ;;  %s1967_s18 = sphi %s2099_s18, %s2585_s18   ;;  %s1963_s17 = sphi %s2097_s17, %s2584_s17  }
   0x9   : > { %s246_s22 = ssub.s32 %s1971_s19, %s2112_s21  ;;  %s249_s23 = sadd.s32 1, %s1967_s18 }
   0xa   : > { %p247_p0 = scmp.eq.s32.totalorder %s246_s22, 0  ;;  %p259_p1 = scmp.ne.s32.totalorder %s1967_s18, %s1963_s17 }
   0xb   : > { %p260_p2 = scmp.eq.s32.totalorder %s2110_s20, 2  ;;  %p1573_p3 = scmp.ge.s32.totalorder %s1971_s19, 1 }
   0xc   : > { %s2120_s24 = scalar_select %p247_p0, %s1967_s18, %s249_s23  }
   0xd   : > { %p2122_p4 = por %p260_p2, %p259_p1  ;;  %p368_p5 = scmp.lt.s32.totalorder %s1971_s19, 4 }
   0xf   : > { %p369_p6 = pnand %p1573_p3, %p368_p5 }
  0x10   : > { %vm495_vm0 = vcmask (!%p369_p6), 1043456   ;;  %s2572_s4 = sld [smem:[#allocation8_spill]] (!%p369_p6)  ;;  %s2130_s28 = smul.u32 (!%p369_p6), 24, %s2110_s20  ;;  %vm476_vm1 = vcmask (!%p369_p6), 31744   ;;  %v2213_v32 = vld [vmem:[%s2559_s5] ss:$0 sm:$0xff] (!%p369_p6) }
  0x11   : > { %372 = sbr.rel (%p369_p6) target bundleno = 412 (0x19c), region = 60  ;;  %s2573_s2 = sld [smem:[#allocation6_spill]] (!%p369_p6)  ;;  %v2225_v38 = vld [vmem:[%s2562_s8] ss:$0 sm:$0xff] (!%p369_p6)  ;;  %vm626_vm2 = vcmask (!%p369_p6), 130048  }
  0x12   : > { %s2137_s12 = smul.u32 (!%p369_p6), 6, %s2110_s20  ;;  %p443_p7 = scmp.lt.s32.totalorder (!%p369_p6), %s2130_s28, 63  ;;  %v2233_v43 = vld [vmem:[%s2560_s6] ss:$0 sm:$0xff] (!%p369_p6) }
  0x13   : > { %s2574_s1 = sld [smem:[#allocation5_spill]] (!%p369_p6)  ;;  %s2575_s0 = sld [smem:[#allocation4_spill]] (!%p369_p6)  ;;  %v2238_v45 = vld [vmem:[%s2563_s9] ss:$0 sm:$0xff] (!%p369_p6) }
  0x14   : > { %p429_p8 = scmp.lt.s32.totalorder (!%p369_p6), %s2137_s12, 15  ;;  %s2576_s3 = sld [smem:[#allocation7_spill]] (!%p369_p6)  ;;  %v2244_v50 = vld [vmem:[%s2561_s7] ss:$0 sm:$0xff] (!%p369_p6) }
  0x16   : > { %v657_v0 = vld [vmem:[%s2572_s4] sm:$0xf] (!%p369_p6) }
  0x17   : > { %1719 = vmatprep.subr.msk.mxu1 (!%p369_p6), %vm495_vm0, %v657_v0  ;;  %v468_v1 = vld [vmem:[%s2573_s2] sm:$0xf] (!%p369_p6) }
  0x18   : > { %1720 = vmatpush3.msk.msra.mxu1 %vm495_vm0, %v657_v0  ;;  %1670 = vmatprep.subr.msk.mxu0 %vm495_vm0, %v468_v1  ;;  %s444_s13 = scalar_select %p443_p7, %s2130_s28, 63 }
  0x19   : > { %1671 = vmatpush3.msk.msra.mxu0 %vm495_vm0, %v468_v1  ;;  %s430_s14 = scalar_select %p429_p8, %s2137_s12, 15 }
  0x1a   : > { %1681 = vmatprep.subr.msk.mxu0 %vm495_vm0, %v657_v0  ;;  %s1575_s15 = sshll.u32 %s444_s13, 3  ;;  %v1576_v33 = vld [vmem:[%s2576_s3] ss:$0 sm:$0xff] }
  0x1b   : > { %s2150_s22 = scalar_lea.vmem %s2574_s1, %s1575_s15  ;;  %s1574_s23 = sshll.u32 %s430_s14, 3 }
  0x1c   : > { %v641_v2 = vld [vmem:[%s2150_s22 + $0x40] sm:$0xff]  ;;  %v642_v3 = vld [vmem:[%s2150_s22 + $0x48] sm:$0xff]  ;;  %s432_s29 = scalar_lea.vmem %s2575_s0, %s1574_s23  ;;  %v643_v4 = vld [vmem:[%s2150_s22 + $0x50] sm:$0xff]  ;;  %s415_s14 = sand.u32 1, %s1963_s17  }
  0x1d   : > { %1695 = vmatprep.mubr.msk.f32.mxu1 %vm476_vm1, %v641_v2  ;;  %v462_v5 = vld [vmem:[%s432_s29] sm:$0xff]  ;;  %v463_v6 = vld [vmem:[%s432_s29 + $0x8] sm:$0xff]  ;;  %v464_v7 = vld [vmem:[%s432_s29 + $0x10] sm:$0xff]  ;;  %s2220_s19 = smul.u32 192, %s415_s14 }
  0x1e   : > { %1696 = vmatmul.mubr.msk.f32.vlgmr.msra.gmra.mrb[0].mxu1 %vm476_vm1, %v642_v3  ;;  %1672 = vmatprep.mubr.msk.f32.mxu0 %vm476_vm1, %v462_v5  ;;  %v644_v8 = vld [vmem:[%s2150_s22 + $0x58] sm:$0xff]  ;;  %v645_v10 = vld [vmem:[%s2150_s22 + $0x60] sm:$0xff]  ;;  %v646_v12 = vld [vmem:[%s2150_s22 + $0x68] sm:$0xff]  ;;  %s2228_s17 = smul.u32 48, %s415_s14 }
  0x1f   : > { %1673 = vmatmul.mubr.msk.f32.vlgmr.msra.gmra.mrb[0].mxu0 %vm476_vm1, %v463_v6  ;;  %1698 = vmatprep.mubr.msk.f32.mxu1 %vm476_vm1, %v643_v4  ;;  %v465_v9 = vld [vmem:[%s432_s29 + $0x18] sm:$0xff]  ;;  %v466_v11 = vld [vmem:[%s432_s29 + $0x20] sm:$0xff]  ;;  %v467_v13 = vld [vmem:[%s432_s29 + $0x28] sm:$0xff]  ;;  %s2255_s14 = scalar_lea.vmem [#allocation3], %s2220_s19   ;;  %s1047_s19 = ssub.s32 (%p2122_p4), 16, %s2137_s12 }
  0x20   : > { %1682 = vmatpush3.msk.msra.mxu0 %vm495_vm0, %v657_v0  ;;  %1675 = vmatprep.mubr.msk.f32.mxu0 %vm476_vm1, %v464_v7  ;;  %v647_v14 = vld [vmem:[%s2150_s22 + $0x70] sm:$0xff]  ;;  %v633_v15 = vld [vmem:[%s2150_s22] sm:$0xff]  ;;  %v648_v16 = vld [vmem:[%s2150_s22 + $0x78] sm:$0xff]  ;;  %s2265_s16 = scalar_lea.vmem [#allocation2], %s2228_s17   ;;  %p1048_p9 = scmp.lt.s32.totalorder (%p2122_p4), %s1047_s19, 6 }
  0x21   : > { %v634_v17 = vld [vmem:[%s2150_s22 + $0x8] sm:$0xff]  ;;  %v649_v18 = vld [vmem:[%s2150_s22 + $0x80] sm:$0xff]  ;;  %v635_v19 = vld [vmem:[%s2150_s22 + $0x10] sm:$0xff] }
  0x22   : > { %1699 = vmatmul.mubr.msk.f32.gmra.mrb[2].mxu1 %vm476_vm1, %v644_v8  ;;  %v650_v20 = vld [vmem:[%s2150_s22 + $0x88] sm:$0xff]  ;;  %v636_v21 = vld [vmem:[%s2150_s22 + $0x18] sm:$0xff]  ;;  %v651_v22 = vld [vmem:[%s2150_s22 + $0x90] sm:$0xff] }
  0x23   : > { %1676 = vmatmul.mubr.msk.f32.gmra.mrb[2].mxu0 %vm476_vm1, %v465_v9  ;;  %1701 = vmatprep.mubr.msk.f32.mxu1 %vm476_vm1, %v645_v10  ;;  %v637_v23 = vld [vmem:[%s2150_s22 + $0x20] sm:$0xff]  ;;  %v652_v24 = vld [vmem:[%s2150_s22 + $0x98] sm:$0xff]  ;;  %v638_v25 = vld [vmem:[%s2150_s22 + $0x28] sm:$0xff] }
  0x24   : > { %1678 = vmatprep.mubr.msk.f32.mxu0 %vm476_vm1, %v466_v11  ;;  %v653_v26 = vld [vmem:[%s2150_s22 + $0xa0] sm:$0xff]  ;;  %v639_v27 = vld [vmem:[%s2150_s22 + $0x30] sm:$0xff]  ;;  %v654_v28 = vld [vmem:[%s2150_s22 + $0xa8] sm:$0xff] }
  0x25   : > { %v640_v29 = vld [vmem:[%s2150_s22 + $0x38] sm:$0xff]  ;;  %v655_v30 = vld [vmem:[%s2150_s22 + $0xb0] sm:$0xff] }
  0x26   : > { %1702 = vmatmul.mubr.msk.f32.gmra.mrb[4].mxu1 %vm476_vm1, %v646_v12  ;;  %v656_v31 = vld [vmem:[%s2150_s22 + $0xb8] sm:$0xff]  ;;  %s1636_s22 = smul.u32 (%p2122_p4), 48, %s2110_s20 }
  0x27   : > { %1679 = vmatmul.mubr.msk.f32.gmra.mrb[4].mxu0 %vm476_vm1, %v467_v13  ;;  %1704 = vmatprep.mubr.msk.f32.mxu1 %vm476_vm1, %v647_v14 }
  0x28   : > { %1683 = vmatprep.mubr.msk.f32.mxu0 %vm476_vm1, %v633_v15  ;;  %s2400_s26 = scalar_lea.vmem (%p2122_p4), %s2564_s10, %s1636_s22  }
  0x2a   : > { %1705 = vmatmul.mubr.msk.f32.gmra.mrb[6].mxu1 %vm476_vm1, %v648_v16 }
  0x2b   : > { %1684 = vmatmul.mubr.msk.f32.vlgmr.msra.gmra.mrb[6].mxu0 %vm476_vm1, %v634_v17  ;;  %1707 = vmatprep.mubr.msk.f32.mxu1 %vm476_vm1, %v649_v18 }
  0x2c   : > { %1686 = vmatprep.mubr.msk.f32.mxu0 %vm476_vm1, %v635_v19 }
  0x2e   : > { %1708 = vmatmul.mubr.msk.f32.gmra.mrb[8].mxu1 %vm476_vm1, %v650_v20 }
  0x2f   : > { %1687 = vmatmul.mubr.msk.f32.gmra.mrb[8].mxu0 %vm476_vm1, %v636_v21  ;;  %1710 = vmatprep.mubr.msk.f32.mxu1 %vm476_vm1, %v651_v22 }
  0x30   : > { %1689 = vmatprep.mubr.msk.f32.mxu0 %vm476_vm1, %v637_v23 }
  0x32   : > { %1711 = vmatmul.mubr.msk.f32.gmra.mrb[10].mxu1 %vm476_vm1, %v652_v24 }
  0x33   : > { %1690 = vmatmul.mubr.msk.f32.gmra.mrb[10].mxu0 %vm476_vm1, %v638_v25  ;;  %1713 = vmatprep.mubr.msk.f32.mxu1 %vm476_vm1, %v653_v26 }
  0x34   : > { %1692 = vmatprep.mubr.msk.f32.mxu0 %vm476_vm1, %v639_v27 }
  0x36   : > { %1714 = vmatmul.mubr.msk.f32.gmra.mrb[12].mxu1 %vm476_vm1, %v654_v28 }
  0x37   : > { %1693 = vmatmul.mubr.msk.f32.gmra.mrb[12].mxu0 %vm476_vm1, %v640_v29  ;;  %1716 = vmatprep.mubr.msk.f32.mxu1 %vm476_vm1, %v655_v30 }
  0x3a   : > { %1717 = vmatmul.mubr.msk.f32.gmra.mrb[14].mxu1 %vm476_vm1, %v656_v31 }
  0xf1   : > { %v1697_v34 = vpop.f32.mrb[0].mxu1 }
  0xf2   : > { %v852_v35 = vadd.f32 %v1697_v34, %v2213_v32  ;;  %v846_v36 = vpop.f32.mrb[1].mxu1  ;;  %v1674_v37 = vpop.f32.mrb[0].mxu0 }
  0xf3   : > { %v847_v39 = vadd.f32 %v2213_v32, %v846_v36  ;;  %v571_v40 = vadd.f32 %v1674_v37, %v1576_v33  ;;  %v565_v41 = vpop.f32.mrb[1].mxu0 }
  0xf4   : > { %v934_v42 = vmax.f32 %v852_v35, 0.0  ;;  %v566_v44 = vadd.f32 %v1576_v33, %v565_v41 }
  0xf5   : > { %v933_v46 = vmax.f32 %v847_v39, 0.0  ;;  %v595_v47 = vmax.f32 %v571_v40, 0.0  ;;  %v1700_v48 = vpop.f32.mrb[2].mxu1 }
  0xf6   : > { %v965_v49 = vmul.f32 %v2225_v38, %v934_v42  ;;  %v594_v51 = vmax.f32 %v566_v44, 0.0  ;;  %v862_v52 = vadd.f32 %v1700_v48, %v2213_v32  ;;  %v856_v53 = vpop.f32.mrb[3].mxu1  ;;  %v1677_v54 = vpop.f32.mrb[2].mxu0 }
  0xf7   : > { %v964_v55 = vmul.f32 %v2225_v38, %v933_v46  ;;  %v608_v56 = vmul.f32 %v2233_v43, %v595_v47  ;;  %v857_v57 = vadd.f32 %v2213_v32, %v856_v53  ;;  %v581_v58 = vadd.f32 %v1677_v54, %v1576_v33  ;;  %v575_v59 = vpop.f32.mrb[3].mxu0 }
  0xf8   : > { %v996_v60 = vadd.f32 %v2238_v45, %v965_v49  ;;  %v607_v61 = vmul.f32 %v2233_v43, %v594_v51  ;;  %v936_v62 = vmax.f32 %v862_v52, 0.0  ;;  %v576_v63 = vadd.f32 %v1576_v33, %v575_v59 }
  0xf9   : > { %v995_v0 = vadd.f32 %v2238_v45, %v964_v55  ;;  %v621_v1 = vadd.f32 %v2244_v50, %v608_v56  ;;  %v935_v2 = vmax.f32 %v857_v57, 0.0  ;;  %v597_v3 = vmax.f32 %v581_v58, 0.0  ;;  %v1703_v4 = vpop.f32.mrb[4].mxu1 }
  0xfa   : > { %1020 = vst.msk [vmem:[%s2255_s14 + $0x48] sm:$0xff] %vm476_vm1, %v996_v60  ;;  %v620_v5 = vadd.f32 %v2244_v50, %v607_v61  ;;  %v967_v6 = vmul.f32 %v2225_v38, %v936_v62  ;;  %v596_v7 = vmax.f32 %v576_v63, 0.0  ;;  %v872_v8 = vadd.f32 %v1703_v4, %v2213_v32  ;;  %v866_v9 = vpop.f32.mrb[5].mxu1  ;;  %v1680_v10 = vpop.f32.mrb[4].mxu0 }
  0xfb   : > { %1019 = vst.msk [vmem:[%s2255_s14 + $0x40] sm:$0xff] %vm476_vm1, %v995_v0  ;;  %v966_v11 = vmul.f32 %v2225_v38, %v935_v2  ;;  %v610_v12 = vmul.f32 %v2233_v43, %v597_v3  ;;  %v867_v13 = vadd.f32 %v2213_v32, %v866_v9  ;;  %v591_v14 = vadd.f32 %v1680_v10, %v1576_v33  ;;  %v585_v15 = vpop.f32.mrb[5].mxu0 }
  0xfc   : > { %628 = vst.msk [vmem:[%s2265_s16 + $0x8] sm:$0xff] %vm626_vm2, %v621_v1  ;;  %627 = vst.msk [vmem:[%s2265_s16] sm:$0xff] %vm626_vm2, %v620_v5  ;;  %v998_v16 = vadd.f32 %v2238_v45, %v967_v6  ;;  %v609_v17 = vmul.f32 %v2233_v43, %v596_v7  ;;  %v938_v18 = vmax.f32 %v872_v8, 0.0  ;;  %v586_v19 = vadd.f32 %v1576_v33, %v585_v15 }
  0xfd   : > { %v997_v20 = vadd.f32 %v2238_v45, %v966_v11  ;;  %v623_v21 = vadd.f32 %v2244_v50, %v610_v12  ;;  %v937_v22 = vmax.f32 %v867_v13, 0.0  ;;  %v599_v23 = vmax.f32 %v591_v14, 0.0  ;;  %v1706_v24 = vpop.f32.mrb[6].mxu1 }
  0xfe   : > { %1022 = vst.msk [vmem:[%s2255_s14 + $0x58] sm:$0xff] %vm476_vm1, %v998_v16  ;;  %v622_v25 = vadd.f32 %v2244_v50, %v609_v17  ;;  %v969_v26 = vmul.f32 %v2225_v38, %v938_v18  ;;  %v598_v27 = vmax.f32 %v586_v19, 0.0  ;;  %v882_v28 = vadd.f32 %v1706_v24, %v2213_v32  ;;  %v876_v29 = vpop.f32.mrb[7].mxu1  ;;  %v1685_v30 = vpop.f32.mrb[6].mxu0 }
  0xff   : > { %1021 = vst.msk [vmem:[%s2255_s14 + $0x50] sm:$0xff] %vm476_vm1, %v997_v20  ;;  %v968_v31 = vmul.f32 %v2225_v38, %v937_v22  ;;  %v612_v33 = vmul.f32 %v2233_v43, %v599_v23  ;;  %v877_v34 = vadd.f32 %v2213_v32, %v876_v29  ;;  %v812_v35 = vadd.f32 %v1685_v30, %v2213_v32  ;;  %v806_v36 = vpop.f32.mrb[7].mxu0 }
 0x100   : > { %630 = vst.msk [vmem:[%s2265_s16 + $0x18] sm:$0xff] %vm626_vm2, %v623_v21  ;;  %629 = vst.msk [vmem:[%s2265_s16 + $0x10] sm:$0xff] %vm626_vm2, %v622_v25  ;;  %v1000_v37 = vadd.f32 %v2238_v45, %v969_v26  ;;  %v611_v39 = vmul.f32 %v2233_v43, %v598_v27  ;;  %v940_v40 = vmax.f32 %v882_v28, 0.0  ;;  %v807_v41 = vadd.f32 %v2213_v32, %v806_v36 }
 0x101   : > { %v999_v42 = vadd.f32 %v2238_v45, %v968_v31  ;;  %v625_v44 = vadd.f32 %v2244_v50, %v612_v33  ;;  %v939_v46 = vmax.f32 %v877_v34, 0.0  ;;  %v926_v47 = vmax.f32 %v812_v35, 0.0  ;;  %v1709_v48 = vpop.f32.mrb[8].mxu1 }
 0x102   : > { %1024 = vst.msk [vmem:[%s2255_s14 + $0x68] sm:$0xff] %vm476_vm1, %v1000_v37  ;;  %v624_v49 = vadd.f32 %v2244_v50, %v611_v39  ;;  %v971_v51 = vmul.f32 %v2225_v38, %v940_v40  ;;  %v925_v52 = vmax.f32 %v807_v41, 0.0  ;;  %v892_v43 = vadd.f32 %v1709_v48, %v2213_v32  ;;  %v886_v53 = vpop.f32.mrb[9].mxu1  ;;  %v1688_v54 = vpop.f32.mrb[8].mxu0 }
 0x103   : > { %1023 = vst.msk [vmem:[%s2255_s14 + $0x60] sm:$0xff] %vm476_vm1, %v999_v42  ;;  %v970_v55 = vmul.f32 %v2225_v38, %v939_v46  ;;  %v957_v56 = vmul.f32 %v2225_v38, %v926_v47  ;;  %v887_v57 = vadd.f32 %v2213_v32, %v886_v53  ;;  %v822_v50 = vadd.f32 %v1688_v54, %v2213_v32  ;;  %v816_v58 = vpop.f32.mrb[9].mxu0 }
 0x104   : > { %632 = vst.msk [vmem:[%s2265_s16 + $0x28] sm:$0xff] %vm626_vm2, %v625_v44  ;;  %631 = vst.msk [vmem:[%s2265_s16 + $0x20] sm:$0xff] %vm626_vm2, %v624_v49  ;;  %v1002_v59 = vadd.f32 %v2238_v45, %v971_v51  ;;  %v956_v60 = vmul.f32 %v2225_v38, %v925_v52  ;;  %v942_v61 = vmax.f32 %v892_v43, 0.0  ;;  %v817_v62 = vadd.f32 %v2213_v32, %v816_v58 }
 0x105   : > { %v1001_v63 = vadd.f32 %v2238_v45, %v970_v55  ;;  %v988_v0 = vadd.f32 %v2238_v45, %v957_v56  ;;  %v941_v1 = vmax.f32 %v887_v57, 0.0  ;;  %v928_v2 = vmax.f32 %v822_v50, 0.0  ;;  %v1712_v3 = vpop.f32.mrb[10].mxu1 }
 0x106   : > { %1026 = vst.msk [vmem:[%s2255_s14 + $0x78] sm:$0xff] %vm476_vm1, %v1002_v59  ;;  %v987_v4 = vadd.f32 %v2238_v45, %v956_v60  ;;  %v973_v5 = vmul.f32 %v2225_v38, %v942_v61  ;;  %v927_v6 = vmax.f32 %v817_v62, 0.0  ;;  %v902_v7 = vadd.f32 %v1712_v3, %v2213_v32  ;;  %v896_v8 = vpop.f32.mrb[11].mxu1  ;;  %v1691_v9 = vpop.f32.mrb[10].mxu0 }
 0x107   : > { %1025 = vst.msk [vmem:[%s2255_s14 + $0x70] sm:$0xff] %vm476_vm1, %v1001_v63  ;;  %1012 = vst.msk [vmem:[%s2255_s14 + $0x8] sm:$0xff] %vm476_vm1, %v988_v0  ;;  %v972_v10 = vmul.f32 %v2225_v38, %v941_v1  ;;  %v959_v11 = vmul.f32 %v2225_v38, %v928_v2  ;;  %v897_v12 = vadd.f32 %v2213_v32, %v896_v8  ;;  %v826_v14 = vpop.f32.mrb[11].mxu0 }
 0x108   : > { %v832_v13 = vadd.f32 %v1691_v9, %v2213_v32  ;;  %1011 = vst.msk [vmem:[%s2255_s14] sm:$0xff] %vm476_vm1, %v987_v4  ;;  %v1004_v15 = vadd.f32 %v2238_v45, %v973_v5  ;;  %v958_v16 = vmul.f32 %v2225_v38, %v927_v6  ;;  %v944_v17 = vmax.f32 %v902_v7, 0.0 }
 0x109   : > { %v827_v18 = vadd.f32 %v2213_v32, %v826_v14  ;;  %v1003_v19 = vadd.f32 %v2238_v45, %v972_v10  ;;  %v990_v20 = vadd.f32 %v2238_v45, %v959_v11  ;;  %v943_v21 = vmax.f32 %v897_v12, 0.0  ;;  %v1715_v23 = vpop.f32.mrb[12].mxu1 }
 0x10a   : > { %v930_v22 = vmax.f32 %v832_v13, 0.0  ;;  %1028 = vst.msk [vmem:[%s2255_s14 + $0x88] sm:$0xff] %vm476_vm1, %v1004_v15  ;;  %v989_v24 = vadd.f32 %v2238_v45, %v958_v16  ;;  %v975_v25 = vmul.f32 %v2225_v38, %v944_v17  ;;  %v912_v27 = vadd.f32 %v1715_v23, %v2213_v32  ;;  %v906_v28 = vpop.f32.mrb[13].mxu1  ;;  %v1694_v29 = vpop.f32.mrb[12].mxu0 }
 0x10b   : > { %v929_v26 = vmax.f32 %v827_v18, 0.0  ;;  %1027 = vst.msk [vmem:[%s2255_s14 + $0x80] sm:$0xff] %vm476_vm1, %v1003_v19  ;;  %1014 = vst.msk [vmem:[%s2255_s14 + $0x18] sm:$0xff] %vm476_vm1, %v990_v20  ;;  %v974_v30 = vmul.f32 %v2225_v38, %v943_v21  ;;  %v907_v33 = vadd.f32 %v2213_v32, %v906_v28  ;;  %v842_v34 = vadd.f32 %v1694_v29, %v2213_v32  ;;  %v836_v35 = vpop.f32.mrb[13].mxu0 }
 0x10c   : > { %v961_v31 = vmul.f32 %v2225_v38, %v930_v22  ;;  %1013 = vst.msk [vmem:[%s2255_s14 + $0x10] sm:$0xff] %vm476_vm1, %v989_v24  ;;  %v1006_v36 = vadd.f32 %v2238_v45, %v975_v25  ;;  %v946_v39 = vmax.f32 %v912_v27, 0.0  ;;  %v837_v40 = vadd.f32 %v2213_v32, %v836_v35 }
 0x10d   : > { %v960_v37 = vmul.f32 %v2225_v38, %v929_v26  ;;  %v1005_v41 = vadd.f32 %v2238_v45, %v974_v30  ;;  %v945_v44 = vmax.f32 %v907_v33, 0.0  ;;  %v932_v46 = vmax.f32 %v842_v34, 0.0  ;;  %v1718_v47 = vpop.f32.mrb[14].mxu1 }
 0x10e   : > { %v992_v42 = vadd.f32 %v2238_v45, %v961_v31  ;;  %1030 = vst.msk [vmem:[%s2255_s14 + $0x98] sm:$0xff] %vm476_vm1, %v1006_v36  ;;  %v977_v49 = vmul.f32 %v2225_v38, %v946_v39  ;;  %v931_v51 = vmax.f32 %v837_v40, 0.0  ;;  %v922_v52 = vadd.f32 %v1718_v47, %v2213_v32  ;;  %v916_v43 = vpop.f32.mrb[15].mxu1 }
 0x10f   : > { %v991_v48 = vadd.f32 %v2238_v45, %v960_v37  ;;  %1029 = vst.msk [vmem:[%s2255_s14 + $0x90] sm:$0xff] %vm476_vm1, %v1005_v41  ;;  %v976_v53 = vmul.f32 %v2225_v38, %v945_v44  ;;  %v963_v54 = vmul.f32 %v2225_v38, %v932_v46  ;;  %v917_v55 = vadd.f32 %v2213_v32, %v916_v43 }
 0x110   : > { %1016 = vst.msk [vmem:[%s2255_s14 + $0x28] sm:$0xff] %vm476_vm1, %v992_v42  ;;  %v1008_v56 = vadd.f32 %v2238_v45, %v977_v49  ;;  %v962_v57 = vmul.f32 %v2225_v38, %v931_v51  ;;  %v948_v50 = vmax.f32 %v922_v52, 0.0 }
 0x111   : > { %1015 = vst.msk [vmem:[%s2255_s14 + $0x20] sm:$0xff] %vm476_vm1, %v991_v48  ;;  %v1007_v58 = vadd.f32 %v2238_v45, %v976_v53  ;;  %v994_v59 = vadd.f32 %v2238_v45, %v963_v54  ;;  %v947_v60 = vmax.f32 %v917_v55, 0.0  ;;  %1045 = sbr.rel (!%p2122_p4) target bundleno = 341 (0x155), region = 64 }
 0x112   : > { %1032 = vst.msk [vmem:[%s2255_s14 + $0xa8] sm:$0xff] %vm476_vm1, %v1008_v56  ;;  %v993_v61 = vadd.f32 %v2238_v45, %v962_v57  ;;  %v979_v32 = vmul.f32 %v2225_v38, %v948_v50 }
 0x113   : > { %1031 = vst.msk [vmem:[%s2255_s14 + $0xa0] sm:$0xff] %vm476_vm1, %v1007_v58  ;;  %1018 = vst.msk [vmem:[%s2255_s14 + $0x38] sm:$0xff] %vm476_vm1, %v994_v59  ;;  %v978_v62 = vmul.f32 %v2225_v38, %v947_v60 }
 0x114   : > { %1017 = vst.msk [vmem:[%s2255_s14 + $0x30] sm:$0xff] %vm476_vm1, %v993_v61  ;;  %v1010_v63 = vadd.f32 %v2238_v45, %v979_v32 }
 0x115   : > { %v1009_v0 = vadd.f32 %v2238_v45, %v978_v62 }
 0x116   : > { %1034 = vst.msk [vmem:[%s2255_s14 + $0xb8] sm:$0xff] %vm476_vm1, %v1010_v63 }
 0x117   : > { %1033 = vst.msk [vmem:[%s2255_s14 + $0xb0] sm:$0xff] %vm476_vm1, %v1009_v0 }
 0x118   : > { %s2588_s19 = smov (!%p1048_p9, %s1047_s19), 6 }
 0x119   : > { %s1614_s27 = sshll.u32 %s2588_s19, 7 }
 0x11a   : > { %p1617_p10 = scmp.eq.s32.totalorder %s1614_s27, 0 }
 0x11b   : > { %1877 = sdivrem.u32 (!%p1617_p10), %s2588_s19, 6 }
 0x11c   : > { %1056 = sbr.rel (%p1617_p10) target bundleno = 341 (0x155), region = 68 }
 0x124   : > { %s2406_s29 = spop.drf %1877 }
 0x125   : > { %p1618_p11 = scmp.le.s32.totalorder %s2406_s29, 0 }
 0x126   : > { %s2577_s12 = smov (!%p1618_p11), %s2400_s26  ;;  %s2578_s30 = smov (!%p1618_p11), %s2265_s16 }
 0x127   : > { %1483 = sbr.rel (%p1618_p11) target bundleno = 312 (0x138), region = 219  ;;  %s2415_s13 = smov (!%p1618_p11), 0  }
 0x128   : > { %s2417_s15 = smov (!%p1618_p11), 0  }
 0x12e LB: >> { %v1130_v38 = vld [vmem:[%s1979_s30] sm:$0xff]  ;;  %v1132_v45 = vld [vmem:[%s1979_s30 + $0x8] sm:$0xff]  ;;  %v1134_v1 = vld [vmem:[%s1979_s30 + $0x10] sm:$0xff]  ;;  %s1142_s22 = sadd.s32 1, %s1983_s13  ;;  %s1124_s15 = sadd.s32 1, %s1987_s15   ;;  %s1987_s15 = sphi %s2417_s15, %s1124_s15   ;;  %s1983_s13 = sphi %s2415_s13, %s2579_s13   ;;  %s1979_s30 = sphi %s2578_s30, %s1147_s30   ;;  %s1975_s12 = sphi %s2577_s12, %s1148_s12  }
 0x12f   : >> { %1131 = vst [vmem:[%s1975_s12] sm:$0xff] %v1130_v38  ;;  %1133 = vst [vmem:[%s1975_s12 + $0x8] sm:$0xff] %v1132_v45  ;;  %v1136_v2 = vld [vmem:[%s1979_s30 + $0x18] sm:$0xff]  ;;  %v1138_v3 = vld [vmem:[%s1979_s30 + $0x20] sm:$0xff]  ;;  %p1143_p12 = scmp.ge.s32.totalorder %s1142_s22, %s2406_s29  ;;  %p1123_p13 = scmp.ge.s32.totalorder %s1124_s15, %s2406_s29 }
 0x130   : >> { %1135 = vst [vmem:[%s1975_s12 + $0x10] sm:$0xff] %v1134_v1  ;;  %v1140_v4 = vld [vmem:[%s1979_s30 + $0x28] sm:$0xff]  ;;  %1137 = vst [vmem:[%s1975_s12 + $0x18] sm:$0xff] %v1136_v2 }
 0x131   : >> { %1139 = vst [vmem:[%s1975_s12 + $0x20] sm:$0xff] %v1138_v3  ;;  %1141 = vst [vmem:[%s1975_s12 + $0x28] sm:$0xff] %v1140_v4  ;;  %s2590_s22 = smov (%p1143_p12, %s1142_s22), 0  ;;  %1126 = sbr.rel (!%p1123_p13) target bundleno = 302 (0x12e), region = 225 }
 0x132   : >> { %s1145_s23 = smul.u32 48, %s2590_s22  ;;  %s2579_s13 = smov %s2590_s22 }
 0x134   : >> { %s1147_s30 = scalar_lea.vmem %s2265_s16, %s1145_s23 [#allocation2]   ;;  %s1148_s12 = scalar_lea.vmem %s2400_s26, %s1145_s23  }
 0x138 PF: > { %1879 = sdivrem.u32 %s2588_s19, 6 }
 0x139   : > { %s1619_s17 = smul.u32 48, %s2406_s29 }
 0x13b   : > { %s1153_s27 = scalar_lea.vmem %s2265_s16, %s1619_s17 [#allocation2]   ;;  %s1155_s23 = scalar_lea.vmem %s2400_s26, %s1619_s17  }
 0x141   : > { %s1880_s0 = spop.drf %1879 }
 0x142   : > { %p1621_p0 = scmp.le.s32.totalorder %s1880_s0, 0 }
 0x143   : > { %s1989_s1 = smov (!%p1621_p0), %s1155_s23   ;;  %s1993_s2 = smov (!%p1621_p0), %s1153_s27  }
 0x144   : > { %1497 = sbr.rel (%p1621_p0) target bundleno = 341 (0x155), region = 230  ;;  %s1997_s3 = smov (!%p1621_p0), 0  }
 0x145   : > { %s2001_s4 = smov (!%p1621_p0), 0  }
 0x14b LB: >> { %v1165_v5 = vld [vmem:[%s1995_s2] sm:$0xff]  ;;  %s1167_s12 = sadd.s32 1, %s1999_s3  ;;  %s1159_s4 = sadd.s32 1, %s2003_s4   ;;  %s2003_s4 = sphi %s2001_s4, %s1159_s4   ;;  %s1999_s3 = sphi %s1997_s3, %s1998_s3   ;;  %s1995_s2 = sphi %s1993_s2, %s1172_s2   ;;  %s1991_s1 = sphi %s1989_s1, %s1173_s1  }
 0x14c   : >> { %1166 = vst [vmem:[%s1991_s1] sm:$0xff] %v1165_v5  ;;  %p1168_p1 = scmp.ge.s32.totalorder %s1167_s12, %s1880_s0  ;;  %p1158_p2 = scmp.ge.s32.totalorder %s1159_s4, %s1880_s0 }
 0x14e   : >> { %s2592_s12 = smov (%p1168_p1, %s1167_s12), 0  ;;  %1161 = sbr.rel (!%p1158_p2) target bundleno = 331 (0x14b), region = 236 }
 0x14f   : >> { %s1622_s16 = sshll.u32 %s2592_s12, 3  ;;  %s1998_s3 = smov %s2592_s12  }
 0x150   : >> { %s1172_s2 = scalar_lea.vmem %s1153_s27, %s1622_s16 [#allocation2]   ;;  %s1173_s1 = scalar_lea.vmem %s1155_s23, %s1622_s16  }
 0x155 PF: > { %1179 = sbr.rel (!%p2122_p4) target bundleno = 412 (0x19c), region = 116  ;;  %s1181_s3 = ssub.s32 (%p2122_p4), 64, %s2130_s28 }
 0x156   : > { %s1637_s19 = smul.u32 (%p2122_p4), 192, %s2110_s20  ;;  %p1182_p3 = scmp.lt.s32.totalorder (%p2122_p4), %s1181_s3, 24 }
 0x158   : > { %s2446_s30 = scalar_lea.vmem (%p2122_p4), %s2565_s11, %s1637_s19  }
 0x15c   : > { %s2594_s3 = smov (!%p1182_p3, %s1181_s3), 24 }
 0x15d   : > { %s1624_s1 = sshll.u32 %s2594_s3, 7 }
 0x15e   : > { %p1627_p5 = scmp.eq.s32.totalorder %s1624_s1, 0 }
 0x15f   : > { %1881 = sdivrem.u32 (!%p1627_p5), %s2594_s3, 24 }
 0x160   : > { %1190 = sbr.rel (%p1627_p5) target bundleno = 412 (0x19c), region = 120 }
 0x168   : > { %s2452_s0 = spop.drf %1881 }
 0x169   : > { %p1628_p4 = scmp.le.s32.totalorder %s2452_s0, 0 }
 0x16a   : > { %s2580_s2 = smov (!%p1628_p4), %s2446_s30  ;;  %s2581_s4 = smov (!%p1628_p4), %s2255_s14 }
 0x16b   : > { %1511 = sbr.rel (%p1628_p4) target bundleno = 383 (0x17f), region = 241  ;;  %s2461_s20 = smov (!%p1628_p4), 0  }
 0x16c   : > { %s2463_s25 = smov (!%p1628_p4), 0  }
 0x172 LB: >> { %v1300_v6 = vld [vmem:[%s2011_s4] sm:$0xff]  ;;  %v1302_v7 = vld [vmem:[%s2011_s4 + $0x8] sm:$0xff]  ;;  %v1304_v8 = vld [vmem:[%s2011_s4 + $0x10] sm:$0xff]  ;;  %s1348_s28 = sadd.s32 1, %s2015_s20  ;;  %s1294_s25 = sadd.s32 1, %s2019_s25   ;;  %s2019_s25 = sphi %s2463_s25, %s1294_s25   ;;  %s2015_s20 = sphi %s2461_s20, %s2583_s20   ;;  %s2011_s4 = sphi %s2581_s4, %s1353_s4   ;;  %s2007_s2 = sphi %s2580_s2, %s2582_s2  }
 0x173   : >> { %1301 = vst [vmem:[%s2007_s2] sm:$0xff] %v1300_v6  ;;  %1303 = vst [vmem:[%s2007_s2 + $0x8] sm:$0xff] %v1302_v7  ;;  %v1306_v9 = vld [vmem:[%s2011_s4 + $0x18] sm:$0xff]  ;;  %v1308_v10 = vld [vmem:[%s2011_s4 + $0x20] sm:$0xff]  ;;  %p1349_p6 = scmp.ge.s32.totalorder %s1348_s28, %s2452_s0  ;;  %p1293_p7 = scmp.ge.s32.totalorder %s1294_s25, %s2452_s0 }
 0x174   : >> { %1305 = vst [vmem:[%s2007_s2 + $0x10] sm:$0xff] %v1304_v8  ;;  %v1310_v11 = vld [vmem:[%s2011_s4 + $0x28] sm:$0xff]  ;;  %1307 = vst [vmem:[%s2007_s2 + $0x18] sm:$0xff] %v1306_v9  ;;  %v1312_v12 = vld [vmem:[%s2011_s4 + $0x30] sm:$0xff] }
 0x175   : >> { %1309 = vst [vmem:[%s2007_s2 + $0x20] sm:$0xff] %v1308_v10  ;;  %1311 = vst [vmem:[%s2007_s2 + $0x28] sm:$0xff] %v1310_v11  ;;  %v1314_v13 = vld [vmem:[%s2011_s4 + $0x38] sm:$0xff]  ;;  %v1316_v14 = vld [vmem:[%s2011_s4 + $0x40] sm:$0xff]  ;;  %s2596_s28 = smov (%p1349_p6, %s1348_s28), 0 }
 0x176   : >> { %1313 = vst [vmem:[%s2007_s2 + $0x30] sm:$0xff] %v1312_v12  ;;  %1315 = vst [vmem:[%s2007_s2 + $0x38] sm:$0xff] %v1314_v13  ;;  %v1318_v15 = vld [vmem:[%s2011_s4 + $0x48] sm:$0xff]  ;;  %v1320_v16 = vld [vmem:[%s2011_s4 + $0x50] sm:$0xff]  ;;  %s1351_s13 = smul.u32 192, %s2596_s28  ;;  %s2583_s20 = smov %s2596_s28 }
 0x177   : >> { %1317 = vst [vmem:[%s2007_s2 + $0x40] sm:$0xff] %v1316_v14  ;;  %v1322_v17 = vld [vmem:[%s2011_s4 + $0x58] sm:$0xff]  ;;  %1319 = vst [vmem:[%s2007_s2 + $0x48] sm:$0xff] %v1318_v15  ;;  %v1324_v18 = vld [vmem:[%s2011_s4 + $0x60] sm:$0xff] }
 0x178   : >> { %1321 = vst [vmem:[%s2007_s2 + $0x50] sm:$0xff] %v1320_v16  ;;  %1323 = vst [vmem:[%s2007_s2 + $0x58] sm:$0xff] %v1322_v17  ;;  %v1326_v19 = vld [vmem:[%s2011_s4 + $0x68] sm:$0xff]  ;;  %v1328_v20 = vld [vmem:[%s2011_s4 + $0x70] sm:$0xff]  ;;  %s1354_s15 = scalar_lea.vmem %s2446_s30, %s1351_s13   ;;  %1296 = sbr.rel (!%p1293_p7) target bundleno = 370 (0x172), region = 247 }
 0x179   : >> { %1325 = vst [vmem:[%s2007_s2 + $0x60] sm:$0xff] %v1324_v18  ;;  %1327 = vst [vmem:[%s2007_s2 + $0x68] sm:$0xff] %v1326_v19  ;;  %v1330_v21 = vld [vmem:[%s2011_s4 + $0x78] sm:$0xff]  ;;  %v1332_v22 = vld [vmem:[%s2011_s4 + $0x80] sm:$0xff] }
 0x17a   : >> { %1329 = vst [vmem:[%s2007_s2 + $0x70] sm:$0xff] %v1328_v20  ;;  %v1334_v23 = vld [vmem:[%s2011_s4 + $0x88] sm:$0xff]  ;;  %1331 = vst [vmem:[%s2007_s2 + $0x78] sm:$0xff] %v1330_v21  ;;  %v1336_v24 = vld [vmem:[%s2011_s4 + $0x90] sm:$0xff] }
 0x17b   : >> { %1333 = vst [vmem:[%s2007_s2 + $0x80] sm:$0xff] %v1332_v22  ;;  %1335 = vst [vmem:[%s2007_s2 + $0x88] sm:$0xff] %v1334_v23  ;;  %v1338_v25 = vld [vmem:[%s2011_s4 + $0x98] sm:$0xff]  ;;  %v1340_v26 = vld [vmem:[%s2011_s4 + $0xa0] sm:$0xff] }
 0x17c   : >> { %1337 = vst [vmem:[%s2007_s2 + $0x90] sm:$0xff] %v1336_v24  ;;  %1339 = vst [vmem:[%s2007_s2 + $0x98] sm:$0xff] %v1338_v25  ;;  %v1342_v27 = vld [vmem:[%s2011_s4 + $0xa8] sm:$0xff]  ;;  %v1344_v28 = vld [vmem:[%s2011_s4 + $0xb0] sm:$0xff] }
 0x17d   : >> { %1341 = vst [vmem:[%s2007_s2 + $0xa0] sm:$0xff] %v1340_v26  ;;  %v1346_v29 = vld [vmem:[%s2011_s4 + $0xb8] sm:$0xff]  ;;  %s1353_s4 = scalar_lea.vmem %s2255_s14, %s1351_s13 [#allocation3]   ;;  %1343 = vst [vmem:[%s2007_s2 + $0xa8] sm:$0xff] %v1342_v27 }
 0x17e   : >> { %1345 = vst [vmem:[%s2007_s2 + $0xb0] sm:$0xff] %v1344_v28  ;;  %1347 = vst [vmem:[%s2007_s2 + $0xb8] sm:$0xff] %v1346_v29  ;;  %s2582_s2 = smov %s1354_s15 }
 0x17f PF: > { %1883 = sdivrem.u32 %s2594_s3, 24 }
 0x180   : > { %s1629_s22 = smul.u32 192, %s2452_s0 }
 0x182   : > { %s1359_s17 = scalar_lea.vmem %s2255_s14, %s1629_s22 [#allocation3]   ;;  %s1361_s27 = scalar_lea.vmem %s2446_s30, %s1629_s22  }
 0x188   : > { %s1884_s23 = spop.drf %1883 }
 0x189   : > { %p1631_p8 = scmp.le.s32.totalorder %s1884_s23, 0 }
 0x18a   : > { %s2021_s12 = smov (!%p1631_p8), %s1361_s27   ;;  %s2025_s16 = smov (!%p1631_p8), %s1359_s17  }
 0x18b   : > { %1525 = sbr.rel (%p1631_p8) target bundleno = 412 (0x19c), region = 252  ;;  %s2029_s19 = smov (!%p1631_p8), 0  }
 0x18c   : > { %s2033_s26 = smov (!%p1631_p8), 0  }
 0x192 LB: >> { %v1371_v30 = vld [vmem:[%s2027_s16] sm:$0xff]  ;;  %s1373_s29 = sadd.s32 1, %s2031_s19  ;;  %s1365_s26 = sadd.s32 1, %s2035_s26   ;;  %s2035_s26 = sphi %s2033_s26, %s1365_s26   ;;  %s2031_s19 = sphi %s2029_s19, %s2030_s19   ;;  %s2027_s16 = sphi %s2025_s16, %s1378_s16   ;;  %s2023_s12 = sphi %s2021_s12, %s1379_s12  }
 0x193   : >> { %1372 = vst [vmem:[%s2023_s12] sm:$0xff] %v1371_v30  ;;  %p1374_p9 = scmp.ge.s32.totalorder %s1373_s29, %s1884_s23  ;;  %p1364_p10 = scmp.ge.s32.totalorder %s1365_s26, %s1884_s23 }
 0x195   : >> { %s2598_s29 = smov (%p1374_p9, %s1373_s29), 0  ;;  %1367 = sbr.rel (!%p1364_p10) target bundleno = 402 (0x192), region = 258 }
 0x196   : >> { %s1632_s14 = sshll.u32 %s2598_s29, 3  ;;  %s2030_s19 = smov %s2598_s29  }
 0x197   : >> { %s1378_s16 = scalar_lea.vmem %s1359_s17, %s1632_s14 [#allocation3]   ;;  %s1379_s12 = scalar_lea.vmem %s1361_s27, %s1632_s14  }
 0x19c PF: > { %p19_p11 = scmp.ge.s32.totalorder %s2112_s21, 5   ;;  %s2584_s17 = smov %s1967_s18 }
 0x19d   : > { %s2585_s18 = smov %s2120_s24  ;;  %s2586_s19 = smov %s2112_s21 }
 0x19e   :  { %21 = sbr.rel (!%p19_p11) target bundleno = 8 (0x8), region = 269 }

// kernel: unet_block_forward.2
= control target key start
LH: loop header
LB: loop body
LE: loop exit
PB: predicated region body
PF: predicated region fallthrough
CT: control target
= control target key end

     0   :  { %s1908_s30 = smov 0   ;;  %s1910_s10 = smov 0   ;;  %s2551_s0 = inlined_call_operand.vmem [shape: f32[128,4], index: 0, kind: input, shape index: {}]   ;;  %s2552_s1 = inlined_call_operand.vmem [shape: f32[512,4], index: 1, kind: input, shape index: {}]   ;;  %s2553_s2 = inlined_call_operand.vmem [shape: f32[4,16], index: 2, kind: input, shape index: {}]   ;;  %s2554_s3 = inlined_call_operand.vmem [shape: f32[1,16], index: 3, kind: input, shape index: {}]   ;;  %s2555_s4 = inlined_call_operand.vmem [shape: f32[4,4], index: 4, kind: input, shape index: {}]   ;;  %s2556_s5 = inlined_call_operand.vmem [shape: f32[1,4], index: 5, kind: input, shape index: {}]   ;;  %s2557_s6 = inlined_call_operand.vmem [shape: f32[16,16], index: 6, kind: output, shape index: {0}]   ;;  %s2558_s7 = inlined_call_operand.vmem [shape: f32[16,16], index: 7, kind: output, shape index: {1}]   ;;  %s2559_s8 = inlined_call_operand.vmem [shape: f32[16,4], index: 8, kind: output, shape index: {2}]   ;;  %s2560_s9 = inlined_call_operand.vmem [shape: f32[16,4], index: 9, kind: output, shape index: {3}]  }
   0x1   :  { %2561 = sst [smem:[#allocation4_spill]] %s2557_s6  ;;  %s1912_s11 = smov 0  }
   0x2   :  { %2562 = sst [smem:[#allocation5_spill]] %s2558_s7  ;;  %s1914_s12 = smov 0  }
   0x3   :  { %s1916_s13 = smov 0  }
   0x4 LB: > { %s29_s14 = sadd.s32 1, %s1847_s11  ;;  %s32_s15 = sadd.s32 1, %s1851_s12  ;;  %s1855_s13 = sphi %s1916_s13, %s20_s13   ;;  %s1851_s12 = sphi %s1914_s12, %s2572_s12   ;;  %s1847_s11 = sphi %s1912_s11, %s2571_s11   ;;  %s1843_s10 = sphi %s1910_s10, %s2570_s10   ;;  %s1839_s30 = sphi %s1908_s30, %s2569_s30  }
   0x5   : > { %p30_p0 = scmp.ge.s32.totalorder %s29_s14, 2  ;;  %p1644_p1 = scmp.ge.s32.totalorder %s1855_s13, 1 }
   0x6   : > { %p366_p2 = scmp.lt.s32.totalorder %s1855_s13, 5 }
   0x7   : > { %s2574_s14 = smov (%p30_p0, %s29_s14), 0  ;;  %s2576_s15 = smov (!%p30_p0, %s32_s15), %s1851_s12 }
   0x8   : > { %2563 = sst [smem:[#allocation2_spill]] %s2574_s14  ;;  %p367_p3 = pnand %p1644_p1, %p366_p2 }
   0x9   : > { %p34_p4 = scmp.ge.s32.totalorder %s2576_s15, 2  ;;  %s1645_s16 = sshll.u32 (!%p367_p3), %s1843_s10, 1 }
   0xa   : > { %370 = sbr.rel (%p367_p3) target bundleno = 423 (0x1a7), region = 44  ;;  %p478_p5 = scmp.lt.s32.totalorder (!%p367_p3), %s1843_s10, 1 }
   0xb   : > { %s2578_s15 = smov (%p34_p4, %s2576_s15), 0  ;;  %s1941_s17 = sadd.s32 (!%p367_p3), %s1839_s30, %s1645_s16 }
   0xc   : > { %2564 = sst [smem:[#allocation3_spill]] %s2578_s15  ;;  %p436_p6 = scmp.lt.s32.totalorder (!%p367_p3), %s1941_s17, 2 }
   0xd   : > { %s2565_s6 = sld [smem:[#allocation4_spill]] (!%p367_p3)  ;;  %s2566_s7 = sld [smem:[#allocation5_spill]] (!%p367_p3) }
   0xe   : > { %p1653_p9 = scmp.ne.s32.totalorder (!%p367_p3), %s1839_s30, 0 }
  0x11   : > { %s2580_s10 = smov (!%p478_p5, %s1843_s10), 1  ;;  %vm498_vm0 = vcmask (!%p1653_p9), 130048   ;;  %vm501_vm1 = vcmask (!%p1653_p9), 31744   ;;  %v1857_v0 = vmov (!%p1653_p9), 0.0  }
  0x12   : > { %s437_s18 = scalar_select %p436_p6, %s1941_s17, 2 }
  0x13   : > { %s1649_s19 = sshll.u32 %s2580_s10, 3 }
  0x14   : > { %s438_s20 = smul.u32 6, %s437_s18  ;;  %s1948_s23 = scalar_lea.vmem %s2565_s6, %s1649_s19 }
  0x15   : > { %s460_s24 = smul.u32 24, %s437_s18  ;;  %s1953_s27 = scalar_lea.vmem %s2566_s7, %s1649_s19  ;;  %499 = vst.msk [vmem:[%s1948_s23] sm:$0xff] (!%p1653_p9), %vm498_vm0, %v1857_v0 }
  0x16   : > { %p443_p7 = scmp.lt.s32.totalorder %s438_s20, 15  ;;  %s1958_s16 = scalar_lea.vmem %s2559_s8, %s1649_s19  ;;  %500 = vst.msk [vmem:[%s1953_s27] sm:$0xff] (!%p1653_p9), %vm498_vm0, %v1857_v0 }
  0x17   : > { %p465_p8 = scmp.lt.s32.totalorder %s460_s24, 63  ;;  %s1963_s14 = scalar_lea.vmem %s2560_s9, %s1649_s19  ;;  %502 = vst.msk [vmem:[%s1958_s16] sm:$0xff] (!%p1653_p9), %vm501_vm1, %v1857_v0 }
  0x18   : > { %s2582_s20 = smov (!%p443_p7, %s438_s20), 15  ;;  %497 = sbr.rel (%p1653_p9) target bundleno = 31 (0x1f), region = 48 }
  0x19   : > { %s2584_s24 = smov (!%p465_p8, %s460_s24), 63  ;;  %s1646_s18 = sshll.u32 %s2582_s20, 3  ;;  %503 = vst.msk [vmem:[%s1963_s14] sm:$0xff] (!%p1653_p9), %vm501_vm1, %v1857_v0 }
  0x1a   : > { %s1968_s25 = scalar_lea.vmem %s2551_s0, %s1646_s18  ;;  %s1648_s26 = sshll.u32 %s2584_s24, 3 }
  0x1b   : > { %s1973_s28 = scalar_lea.vmem %s2552_s1, %s1648_s26 }
  0x1f PF: > { %vm539_vm2 = vcmask 1043456   ;;  %v668_v1 = vld [vmem:[%s2555_s4] sm:$0xf]  ;;  %vm520_vm3 = vcmask 31744   ;;  %v653_v3 = vld [vmem:[%s1973_s28 + $0x48] sm:$0xff]  ;;  %v654_v7 = vld [vmem:[%s1973_s28 + $0x50] sm:$0xff] }
  0x20   : > { %v652_v2 = vld [vmem:[%s1973_s28 + $0x40] sm:$0xff]  ;;  %1774 = vmatprep.subr.msk.mxu1 %vm539_vm2, %v668_v1  ;;  %v507_v6 = vld [vmem:[%s1968_s25 + $0x8] sm:$0xff]  ;;  %v508_v8 = vld [vmem:[%s1968_s25 + $0x10] sm:$0xff]  ;;  %s960_s19 = sadd.s32 1, %s1941_s17 }
  0x21   : > { %1750 = vmatprep.mubr.msk.f32.mxu1 %vm520_vm3, %v652_v2  ;;  %v512_v4 = vld [vmem:[%s2553_s2] sm:$0xf]  ;;  %1775 = vmatpush3.msk.msra.mxu1 %vm539_vm2, %v668_v1  ;;  %v655_v9 = vld [vmem:[%s1973_s28 + $0x58] sm:$0xff]  ;;  %v657_v13 = vld [vmem:[%s1973_s28 + $0x68] sm:$0xff]  ;;  %s2053_s20 = smul.u32 48, %s960_s19 }
  0x22   : > { %v506_v5 = vld [vmem:[%s1968_s25] sm:$0xff]  ;;  %1725 = vmatprep.subr.msk.mxu0 %vm539_vm2, %v512_v4  ;;  %1751 = vmatmul.mubr.msk.f32.vlgmr.msra.gmra.mrb[0].mxu1 %vm520_vm3, %v653_v3  ;;  %v509_v11 = vld [vmem:[%s1968_s25 + $0x18] sm:$0xff]  ;;  %v658_v14 = vld [vmem:[%s1973_s28 + $0x70] sm:$0xff] }
  0x23   : > { %1726 = vmatpush3.msk.msra.mxu0 %vm539_vm2, %v512_v4  ;;  %1727 = vmatprep.mubr.msk.f32.mxu0 %vm520_vm3, %v506_v5  ;;  %v656_v10 = vld [vmem:[%s1973_s28 + $0x60] sm:$0xff]  ;;  %v511_v15 = vld [vmem:[%s1968_s25 + $0x28] sm:$0xff]  ;;  %v659_v17 = vld [vmem:[%s1973_s28 + $0x78] sm:$0xff]  ;;  %p1689_p10 = scmp.gt.s32.totalorder %s2053_s20, 128 }
  0x24   : > { %1736 = vmatprep.subr.msk.mxu0 %vm539_vm2, %v668_v1  ;;  %1728 = vmatmul.mubr.msk.f32.vlgmr.msra.gmra.mrb[0].mxu0 %vm520_vm3, %v507_v6  ;;  %v510_v12 = vld [vmem:[%s1968_s25 + $0x20] sm:$0xff]  ;;  %v645_v19 = vld [vmem:[%s1973_s28 + $0x8] sm:$0xff]  ;;  %v646_v20 = vld [vmem:[%s1973_s28 + $0x10] sm:$0xff]  ;;  %vm967_vm4 = vcmask (!%p1689_p10), 130048  }
  0x25   : > { %1753 = vmatprep.mubr.msk.f32.mxu1 %vm520_vm3, %v654_v7  ;;  %1737 = vmatpush3.msk.msra.mxu0 %vm539_vm2, %v668_v1  ;;  %v644_v16 = vld [vmem:[%s1973_s28] sm:$0xff]  ;;  %v661_v21 = vld [vmem:[%s1973_s28 + $0x88] sm:$0xff]  ;;  %v662_v22 = vld [vmem:[%s1973_s28 + $0x90] sm:$0xff] }
  0x26   : > { %1730 = vmatprep.mubr.msk.f32.mxu0 %vm520_vm3, %v508_v8  ;;  %1754 = vmatmul.mubr.msk.f32.gmra.mrb[2].mxu1 %vm520_vm3, %v655_v9  ;;  %v660_v18 = vld [vmem:[%s1973_s28 + $0x80] sm:$0xff]  ;;  %v647_v23 = vld [vmem:[%s1973_s28 + $0x18] sm:$0xff]  ;;  %v649_v27 = vld [vmem:[%s1973_s28 + $0x28] sm:$0xff] }
  0x27   : > { %1756 = vmatprep.mubr.msk.f32.mxu1 %vm520_vm3, %v656_v10  ;;  %v648_v24 = vld [vmem:[%s1973_s28 + $0x20] sm:$0xff]  ;;  %v663_v25 = vld [vmem:[%s1973_s28 + $0x98] sm:$0xff]  ;;  %v650_v28 = vld [vmem:[%s1973_s28 + $0x30] sm:$0xff] }
  0x28   : > { %1731 = vmatmul.mubr.msk.f32.gmra.mrb[2].mxu0 %vm520_vm3, %v509_v11  ;;  %v664_v26 = vld [vmem:[%s1973_s28 + $0xa0] sm:$0xff]  ;;  %v665_v29 = vld [vmem:[%s1973_s28 + $0xa8] sm:$0xff]  ;;  %v666_v30 = vld [vmem:[%s1973_s28 + $0xb0] sm:$0xff] }
  0x29   : > { %1733 = vmatprep.mubr.msk.f32.mxu0 %vm520_vm3, %v510_v12  ;;  %v651_v31 = vld [vmem:[%s1973_s28 + $0x38] sm:$0xff]  ;;  %v2058_v33 = vld [vmem:[%s2556_s5] ss:$0 sm:$0xff] }
  0x2a   : > { %1757 = vmatmul.mubr.msk.f32.gmra.mrb[4].mxu1 %vm520_vm3, %v657_v13  ;;  %v667_v32 = vld [vmem:[%s1973_s28 + $0xb8] sm:$0xff]  ;;  %v1655_v35 = vld [vmem:[%s2554_s3] ss:$0 sm:$0xff] }
  0x2b   : > { %1759 = vmatprep.mubr.msk.f32.mxu1 %vm520_vm3, %v658_v14 }
  0x2c   : > { %1734 = vmatmul.mubr.msk.f32.gmra.mrb[4].mxu0 %vm520_vm3, %v511_v15 }
  0x2d   : > { %1738 = vmatprep.mubr.msk.f32.mxu0 %vm520_vm3, %v644_v16 }
  0x2e   : > { %1760 = vmatmul.mubr.msk.f32.gmra.mrb[6].mxu1 %vm520_vm3, %v659_v17 }
  0x2f   : > { %1762 = vmatprep.mubr.msk.f32.mxu1 %vm520_vm3, %v660_v18 }
  0x30   : > { %1739 = vmatmul.mubr.msk.f32.vlgmr.msra.gmra.mrb[6].mxu0 %vm520_vm3, %v645_v19 }
  0x31   : > { %1741 = vmatprep.mubr.msk.f32.mxu0 %vm520_vm3, %v646_v20 }
  0x32   : > { %1763 = vmatmul.mubr.msk.f32.gmra.mrb[8].mxu1 %vm520_vm3, %v661_v21 }
  0x33   : > { %1765 = vmatprep.mubr.msk.f32.mxu1 %vm520_vm3, %v662_v22 }
  0x34   : > { %1742 = vmatmul.mubr.msk.f32.gmra.mrb[8].mxu0 %vm520_vm3, %v647_v23 }
  0x35   : > { %1744 = vmatprep.mubr.msk.f32.mxu0 %vm520_vm3, %v648_v24 }
  0x36   : > { %1766 = vmatmul.mubr.msk.f32.gmra.mrb[10].mxu1 %vm520_vm3, %v663_v25 }
  0x37   : > { %1768 = vmatprep.mubr.msk.f32.mxu1 %vm520_vm3, %v664_v26 }
  0x38   : > { %1745 = vmatmul.mubr.msk.f32.gmra.mrb[10].mxu0 %vm520_vm3, %v649_v27 }
  0x39   : > { %1747 = vmatprep.mubr.msk.f32.mxu0 %vm520_vm3, %v650_v28 }
  0x3a   : > { %1769 = vmatmul.mubr.msk.f32.gmra.mrb[12].mxu1 %vm520_vm3, %v665_v29 }
  0x3b   : > { %1771 = vmatprep.mubr.msk.f32.mxu1 %vm520_vm3, %v666_v30 }
  0x3c   : > { %1748 = vmatmul.mubr.msk.f32.gmra.mrb[12].mxu0 %vm520_vm3, %v651_v31 }
  0x3e   : > { %1772 = vmatmul.mubr.msk.f32.gmra.mrb[14].mxu1 %vm520_vm3, %v667_v32 }
  0xf5   : > { %v1752_v34 = vpop.f32.mrb[0].mxu1 }
  0xf6   : > { %v863_v36 = vadd.f32 %v1752_v34, %v2058_v33  ;;  %v857_v37 = vpop.f32.mrb[1].mxu1 }
  0xf7   : > { %v858_v38 = vadd.f32 %v2058_v33, %v857_v37  ;;  %v1729_v39 = vpop.f32.mrb[0].mxu0 }
  0xf8   : > { %v2065_v40 = vmax.f32 %v863_v36, 0.0  ;;  %v615_v41 = vadd.f32 %v1729_v39, %v1655_v35  ;;  %v609_v42 = vpop.f32.mrb[1].mxu0 }
  0xf9   : > { %v2067_v43 = vmax.f32 %v858_v38, 0.0  ;;  %v610_v44 = vadd.f32 %v1655_v35, %v609_v42  ;;  %v1755_v45 = vpop.f32.mrb[2].mxu1 }
  0xfa   : > { %v2069_v46 = vmax.f32 %v615_v41, 0.0  ;;  %v873_v47 = vadd.f32 %v1755_v45, %v2058_v33  ;;  %v867_v48 = vpop.f32.mrb[3].mxu1 }
  0xfb   : > { %v2072_v49 = vmax.f32 %v610_v44, 0.0  ;;  %v868_v50 = vadd.f32 %v2058_v33, %v867_v48  ;;  %v1732_v51 = vpop.f32.mrb[2].mxu0 }
  0xfc   : > { %v2075_v52 = vmax.f32 %v873_v47, 0.0  ;;  %v625_v53 = vadd.f32 %v1732_v51, %v1655_v35  ;;  %v619_v54 = vpop.f32.mrb[3].mxu0 }
  0xfd   : > { %v2077_v55 = vmax.f32 %v868_v50, 0.0  ;;  %v620_v56 = vadd.f32 %v1655_v35, %v619_v54  ;;  %v1758_v57 = vpop.f32.mrb[4].mxu1 }
  0xfe   : > { %v2079_v58 = vmax.f32 %v625_v53, 0.0  ;;  %v883_v59 = vadd.f32 %v1758_v57, %v2058_v33  ;;  %v877_v60 = vpop.f32.mrb[5].mxu1 }
  0xff   : > { %v2082_v61 = vmax.f32 %v620_v56, 0.0  ;;  %v878_v62 = vadd.f32 %v2058_v33, %v877_v60  ;;  %v1735_v63 = vpop.f32.mrb[4].mxu0 }
 0x100   : > { %v2085_v0 = vmax.f32 %v883_v59, 0.0  ;;  %v635_v1 = vadd.f32 %v1735_v63, %v1655_v35  ;;  %v629_v2 = vpop.f32.mrb[5].mxu0 }
 0x101   : > { %v2087_v3 = vmax.f32 %v878_v62, 0.0  ;;  %v630_v4 = vadd.f32 %v1655_v35, %v629_v2  ;;  %v1761_v5 = vpop.f32.mrb[6].mxu1 }
 0x102   : > { %v2089_v6 = vmax.f32 %v635_v1, 0.0  ;;  %v893_v7 = vadd.f32 %v1761_v5, %v2058_v33  ;;  %v887_v8 = vpop.f32.mrb[7].mxu1 }
 0x103   : > { %v2092_v9 = vmax.f32 %v630_v4, 0.0  ;;  %v888_v10 = vadd.f32 %v2058_v33, %v887_v8  ;;  %v1740_v11 = vpop.f32.mrb[6].mxu0 }
 0x104   : > { %v2095_v12 = vmax.f32 %v893_v7, 0.0  ;;  %v823_v13 = vadd.f32 %v1740_v11, %v2058_v33  ;;  %v817_v14 = vpop.f32.mrb[7].mxu0  ;;  %v983_v11 = vmul.f32 (!%p1689_p10), %v2069_v46, %v2069_v46 }
 0x105   : > { %v2098_v15 = vmax.f32 %v888_v10, 0.0  ;;  %v818_v16 = vadd.f32 %v2058_v33, %v817_v14  ;;  %v1764_v17 = vpop.f32.mrb[8].mxu1  ;;  %v982_v10 = vmul.f32 (!%p1689_p10), %v2072_v49, %v2072_v49  ;;  %v969_v14 = vsel (!%p1689_p10), %vm967_vm4, %v2069_v46, 0.0 }
 0x106   : > { %v2101_v18 = vmax.f32 %v823_v13, 0.0  ;;  %v903_v19 = vadd.f32 %v1764_v17, %v2058_v33  ;;  %v897_v20 = vpop.f32.mrb[9].mxu1  ;;  %v984_v13 = vmul.f32 (!%p1689_p10), %v2082_v61, %v2082_v61 }
 0x107   : > { %v2104_v21 = vmax.f32 %v818_v16, 0.0  ;;  %v898_v22 = vadd.f32 %v2058_v33, %v897_v20  ;;  %v1743_v23 = vpop.f32.mrb[8].mxu0  ;;  %v971_v16 = vsel (!%p1689_p10), %vm967_vm4, %v2082_v61, 0.0  ;;  %v973_v20 = vsel (!%p1689_p10), %vm967_vm4, %v2079_v58, 0.0 }
 0x108   : > { %v2107_v24 = vmax.f32 %v903_v19, 0.0  ;;  %v833_v25 = vadd.f32 %v1743_v23, %v2058_v33  ;;  %v827_v26 = vpop.f32.mrb[9].mxu0  ;;  %v985_v19 = vmul.f32 (!%p1689_p10), %v2079_v58, %v2079_v58  ;;  %v988_v23 = vsel (!%p1689_p10), %vm967_vm4, %v982_v10, 0.0 }
 0x109   : > { %v2110_v27 = vmax.f32 %v898_v22, 0.0  ;;  %v828_v28 = vadd.f32 %v2058_v33, %v827_v26  ;;  %v1767_v29 = vpop.f32.mrb[10].mxu1  ;;  %v986_v22 = vmul.f32 (!%p1689_p10), %v2092_v9, %v2092_v9 }
 0x10a   : > { %v2113_v30 = vmax.f32 %v833_v25, 0.0  ;;  %v913_v31 = vadd.f32 %v1767_v29, %v2058_v33  ;;  %v907_v32 = vpop.f32.mrb[11].mxu1  ;;  %v989_v25 = vsel (!%p1689_p10), %vm967_vm4, %v983_v11, 0.0 }
 0x10b   : > { %v2116_v34 = vmax.f32 %v828_v28, 0.0  ;;  %v908_v35 = vadd.f32 %v2058_v33, %v907_v32  ;;  %v1746_v36 = vpop.f32.mrb[10].mxu0  ;;  %v975_v28 = vsel (!%p1689_p10), %vm967_vm4, %v2092_v9, 0.0  ;;  %v990_v29 = vadd.f32 (!%p1689_p10), %v989_v25, %v988_v23 }
 0x10c   : > { %v2119_v37 = vmax.f32 %v913_v31, 0.0  ;;  %v843_v38 = vadd.f32 %v1746_v36, %v2058_v33  ;;  %v837_v39 = vpop.f32.mrb[11].mxu0  ;;  %v991_v31 = vsel (!%p1689_p10), %vm967_vm4, %v984_v13, 0.0  ;;  %v987_v32 = vmul.f32 (!%p1689_p10), %v2089_v6, %v2089_v6  ;;  %v981_v13 = vld [vmem:[%s1953_s27] sm:$0xff] (!%p1689_p10) }
 0x10d   : > { %v2122_v41 = vmax.f32 %v908_v35, 0.0  ;;  %v838_v42 = vadd.f32 %v2058_v33, %v837_v39  ;;  %v1770_v44 = vpop.f32.mrb[12].mxu1  ;;  %v993_v35 = vsel (!%p1689_p10), %vm967_vm4, %v985_v19, 0.0  ;;  %v1002_v36 = vsel (!%p1689_p10), %vm520_vm3, %v2104_v21, 0.0 }
 0x10e   : > { %v2125_v45 = vmax.f32 %v843_v38, 0.0  ;;  %v923_v47 = vadd.f32 %v1770_v44, %v2058_v33  ;;  %v917_v48 = vpop.f32.mrb[13].mxu1  ;;  %v1003_v38 = vsel (!%p1689_p10), %vm520_vm3, %v2101_v18, 0.0 }
 0x10f   : > { %v2128_v50 = vmax.f32 %v838_v42, 0.0  ;;  %v918_v51 = vadd.f32 %v2058_v33, %v917_v48  ;;  %v1749_v53 = vpop.f32.mrb[12].mxu0  ;;  %965 = sbr.rel (%p1689_p10) target bundleno = 334 (0x14e), region = 52  ;;  %v992_v42 = vadd.f32 (!%p1689_p10), %v991_v31, %v990_v29  ;;  %v1004_v44 = vadd.f32 (!%p1689_p10), %v1003_v38, %v1002_v36 }
 0x110   : > { %v2131_v54 = vmax.f32 %v923_v47, 0.0  ;;  %v853_v56 = vadd.f32 %v1749_v53, %v2058_v33  ;;  %v847_v57 = vpop.f32.mrb[13].mxu0  ;;  %v1005_v47 = vsel (!%p1689_p10), %vm520_vm3, %v2116_v34, 0.0  ;;  %v977_v48 = vsel (!%p1689_p10), %vm967_vm4, %v2089_v6, 0.0 }
 0x111   : > { %v2134_v59 = vmax.f32 %v918_v51, 0.0  ;;  %v848_v60 = vadd.f32 %v2058_v33, %v847_v57  ;;  %v1773_v62 = vpop.f32.mrb[14].mxu1  ;;  %v995_v51 = vsel (!%p1689_p10), %vm967_vm4, %v986_v22, 0.0  ;;  %v1007_v53 = vsel (!%p1689_p10), %vm520_vm3, %v2113_v30, 0.0 }
 0x112   : > { %v2137_v63 = vmax.f32 %v853_v56, 0.0  ;;  %v933_v1 = vadd.f32 %v1773_v62, %v2058_v33  ;;  %v927_v2 = vpop.f32.mrb[15].mxu1  ;;  %v994_v57 = vadd.f32 (!%p1689_p10), %v993_v35, %v992_v42  ;;  %v966_v62 = vld [vmem:[%s1948_s23] sm:$0xff] (!%p1689_p10)  ;;  %v1053_v31 = vmul.f32 (!%p1689_p10), %v2101_v18, %v2101_v18 }
 0x113   : > { %v2140_v4 = vmax.f32 %v848_v60, 0.0  ;;  %v928_v5 = vadd.f32 %v2058_v33, %v927_v2  ;;  %v968_v33 = vsel (!%p1689_p10), %vm967_vm4, %v2072_v49, 0.0  ;;  %v1006_v60 = vadd.f32 (!%p1689_p10), %v1005_v47, %v1004_v44 }
 0x114   : > { %v2143_v7 = vmax.f32 %v933_v1, 0.0  ;;  %v970_v17 = vadd.f32 (!%p1689_p10), %v969_v14, %v968_v33  ;;  %v997_v1 = vsel (!%p1689_p10), %vm967_vm4, %v987_v32, 0.0  ;;  %v1009_v2 = vsel (!%p1689_p10), %vm520_vm3, %v2128_v50, 0.0 }
 0x115   : > { %v2145_v8 = vmax.f32 %v928_v5, 0.0  ;;  %v996_v10 = vadd.f32 (!%p1689_p10), %v995_v51, %v994_v57  ;;  %v1008_v11 = vadd.f32 (!%p1689_p10), %v1007_v53, %v1006_v60  ;;  %v1011_v33 = vsel (!%p1689_p10), %vm520_vm3, %v2125_v45, 0.0 }
 0x116   : > { %v972_v26 = vadd.f32 %v971_v16, %v970_v17  ;;  %v1013_v19 = vsel %vm520_vm3, %v2140_v4, 0.0  ;;  %v1015_v23 = vsel %vm520_vm3, %v2137_v63, 0.0  ;;  %v1054_v32 = vmul.f32 %v2116_v34, %v2116_v34 }
 0x117   : > { %v998_v16 = vadd.f32 %v997_v1, %v996_v10  ;;  %v1010_v17 = vadd.f32 %v1009_v2, %v1008_v11  ;;  %v1019_v35 = vsel %vm520_vm3, %v2065_v40, 0.0  ;;  %v1055_v38 = vmul.f32 %v2113_v30, %v2113_v30 }
 0x118   : > { %v974_v39 = vadd.f32 %v973_v20, %v972_v26  ;;  %v1017_v26 = vsel %vm520_vm3, %v2067_v43, 0.0  ;;  %v1056_v47 = vmul.f32 %v2128_v50, %v2128_v50  ;;  %v1079_v51 = vsel %vm520_vm3, %v1054_v32, 0.0 }
 0x119   : > { %v999_v20 = vadd.f32 %v998_v16, %v981_v13  ;;  %v1012_v22 = vadd.f32 %v1011_v33, %v1010_v17  ;;  %v1023_v53 = vsel %vm520_vm3, %v2075_v52, 0.0  ;;  %v1057_v60 = vmul.f32 %v2125_v45, %v2125_v45 }
 0x11a   : > { %v976_v56 = vadd.f32 %v975_v28, %v974_v39  ;;  %v1052_v28 = vmul.f32 %v2104_v21, %v2104_v21  ;;  %v1021_v39 = vsel %vm520_vm3, %v2077_v55, 0.0  ;;  %v1025_v1 = vsel %vm520_vm3, %v2087_v3, 0.0 }
 0x11b   : > { %1000 = vst.msk [vmem:[%s1953_s27] sm:$0xff] %vm967_vm4, %v999_v20  ;;  %v1014_v25 = vadd.f32 %v1013_v19, %v1012_v22  ;;  %v1058_v10 = vmul.f32 %v2140_v4, %v2140_v4  ;;  %v1083_v11 = vsel %vm520_vm3, %v1056_v47, 0.0  ;;  %v1027_v13 = vsel %vm520_vm3, %v2085_v0, 0.0 }
 0x11c   : > { %v978_v5 = vadd.f32 %v977_v48, %v976_v56  ;;  %v1076_v42 = vsel %vm520_vm3, %v1052_v28, 0.0  ;;  %v1077_v48 = vsel %vm520_vm3, %v1053_v31, 0.0  ;;  %v1059_v16 = vmul.f32 %v2137_v63, %v2137_v63 }
 0x11d   : > { %v1016_v29 = vadd.f32 %v1015_v23, %v1014_v25  ;;  %v1078_v56 = vadd.f32 %v1077_v48, %v1076_v42  ;;  %v1085_v17 = vsel %vm520_vm3, %v1057_v60, 0.0  ;;  %v1029_v19 = vsel %vm520_vm3, %v2098_v15, 0.0 }
 0x11e   : > { %v979_v14 = vadd.f32 %v978_v5, %v966_v62  ;;  %v1081_v62 = vsel %vm520_vm3, %v1055_v38, 0.0  ;;  %v1060_v23 = vmul.f32 %v2067_v43, %v2067_v43  ;;  %v1087_v25 = vsel %vm520_vm3, %v1058_v10, 0.0 }
 0x11f   : > { %v1018_v36 = vadd.f32 %v1017_v26, %v1016_v29  ;;  %v1080_v2 = vadd.f32 %v1079_v51, %v1078_v56  ;;  %v1031_v26 = vsel %vm520_vm3, %v2095_v12, 0.0  ;;  %v1061_v31 = vmul.f32 %v2065_v40, %v2065_v40 }
 0x120   : > { %980 = vst.msk [vmem:[%s1948_s23] sm:$0xff] %vm967_vm4, %v979_v14  ;;  %v1089_v32 = vsel %vm520_vm3, %v1059_v16, 0.0  ;;  %v1091_v42 = vsel %vm520_vm3, %v1060_v23, 0.0  ;;  %v1063_v51 = vmul.f32 %v2075_v52, %v2075_v52  ;;  %v1037_v56 = vsel %vm520_vm3, %v2122_v41, 0.0 }
 0x121   : > { %v1020_v44 = vadd.f32 %v1019_v35, %v1018_v36  ;;  %v1082_v33 = vadd.f32 %v1081_v62, %v1080_v2  ;;  %v1033_v35 = vsel %vm520_vm3, %v2110_v27, 0.0  ;;  %v1064_v62 = vmul.f32 %v2087_v3, %v2087_v3 }
 0x122   : > { %v1039_v2 = vsel %vm520_vm3, %v2119_v37, 0.0 }
 0x123   : > { %v1022_v57 = vadd.f32 %v1021_v39, %v1020_v44  ;;  %v1084_v20 = vadd.f32 %v1083_v11, %v1082_v33  ;;  %v1062_v39 = vmul.f32 %v2077_v55, %v2077_v55  ;;  %v1035_v44 = vsel %vm520_vm3, %v2107_v24, 0.0 }
 0x124   : > { %v1065_v11 = vmul.f32 %v2085_v0, %v2085_v0  ;;  %v1041_v33 = vsel %vm520_vm3, %v2134_v59, 0.0 }
 0x125   : > { %v1024_v5 = vadd.f32 %v1023_v53, %v1022_v57  ;;  %v1086_v28 = vadd.f32 %v1085_v17, %v1084_v20  ;;  %v1093_v53 = vsel %vm520_vm3, %v1061_v31, 0.0  ;;  %v1066_v17 = vmul.f32 %v2098_v15, %v2098_v15 }
 0x126   : > { %v1043_v20 = vsel %vm520_vm3, %v2131_v54, 0.0 }
 0x127   : > { %v1026_v14 = vadd.f32 %v1025_v1, %v1024_v5  ;;  %v1088_v36 = vadd.f32 %v1087_v25, %v1086_v28  ;;  %v1095_v1 = vsel %vm520_vm3, %v1062_v39, 0.0  ;;  %v1067_v25 = vmul.f32 %v2095_v12, %v2095_v12 }
 0x128   : > { %v1045_v28 = vsel %vm520_vm3, %v2145_v8, 0.0 }
 0x129   : > { %v1028_v22 = vadd.f32 %v1027_v13, %v1026_v14  ;;  %v1090_v47 = vadd.f32 %v1089_v32, %v1088_v36  ;;  %v1097_v13 = vsel %vm520_vm3, %v1063_v51, 0.0  ;;  %v1068_v32 = vmul.f32 %v2110_v27, %v2110_v27 }
 0x12a   : > { %v1047_v36 = vsel %vm520_vm3, %v2143_v7, 0.0 }
 0x12b   : > { %v1030_v29 = vadd.f32 %v1029_v19, %v1028_v22  ;;  %v1092_v57 = vadd.f32 %v1091_v42, %v1090_v47  ;;  %v1099_v19 = vsel %vm520_vm3, %v1064_v62, 0.0  ;;  %v1069_v42 = vmul.f32 %v2107_v24, %v2107_v24  ;;  %v1001_v47 = vld [vmem:[%s1958_s16] sm:$0xff] }
 0x12c   : > { %v1071_v62 = vmul.f32 %v2119_v37, %v2119_v37 }
 0x12d   : > { %v1032_v38 = vadd.f32 %v1031_v26, %v1030_v29  ;;  %v1094_v5 = vadd.f32 %v1093_v53, %v1092_v57  ;;  %v1101_v26 = vsel %vm520_vm3, %v1065_v11, 0.0  ;;  %v1070_v53 = vmul.f32 %v2122_v41, %v2122_v41 }
 0x12f   : > { %v1034_v48 = vadd.f32 %v1033_v35, %v1032_v38  ;;  %v1096_v14 = vadd.f32 %v1095_v1, %v1094_v5  ;;  %v1103_v35 = vsel %vm520_vm3, %v1066_v17, 0.0  ;;  %v1109_v1 = vsel %vm520_vm3, %v1069_v42, 0.0 }
 0x130   : > { %v1072_v5 = vmul.f32 %v2134_v59, %v2134_v59 }
 0x131   : > { %v1036_v60 = vadd.f32 %v1035_v44, %v1034_v48  ;;  %v1098_v22 = vadd.f32 %v1097_v13, %v1096_v14  ;;  %v1105_v44 = vsel %vm520_vm3, %v1067_v25, 0.0  ;;  %v1073_v13 = vmul.f32 %v2131_v54, %v2131_v54 }
 0x132   : > { %v1115_v17 = vsel %vm520_vm3, %v1072_v5, 0.0 }
 0x133   : > { %v1038_v10 = vadd.f32 %v1037_v56, %v1036_v60  ;;  %v1100_v29 = vadd.f32 %v1099_v19, %v1098_v22  ;;  %v1107_v56 = vsel %vm520_vm3, %v1068_v32, 0.0  ;;  %v1117_v22 = vsel %vm520_vm3, %v1073_v13, 0.0 }
 0x135   : > { %v1040_v16 = vadd.f32 %v1039_v2, %v1038_v10  ;;  %v1102_v38 = vadd.f32 %v1101_v26, %v1100_v29  ;;  %v1111_v10 = vsel %vm520_vm3, %v1070_v53, 0.0 }
 0x137   : > { %v1042_v23 = vadd.f32 %v1041_v33, %v1040_v16  ;;  %v1104_v48 = vadd.f32 %v1103_v35, %v1102_v38  ;;  %v1113_v33 = vsel %vm520_vm3, %v1071_v62, 0.0  ;;  %v1074_v16 = vmul.f32 %v2145_v8, %v2145_v8 }
 0x139   : > { %v1044_v31 = vadd.f32 %v1043_v20, %v1042_v23  ;;  %v1106_v57 = vadd.f32 %v1105_v44, %v1104_v48  ;;  %v1075_v20 = vmul.f32 %v2143_v7, %v2143_v7  ;;  %v1119_v25 = vsel %vm520_vm3, %v1074_v16, 0.0 }
 0x13b   : > { %v1046_v39 = vadd.f32 %v1045_v28, %v1044_v31  ;;  %v1108_v2 = vadd.f32 %v1107_v56, %v1106_v57  ;;  %v1121_v28 = vsel %vm520_vm3, %v1075_v20, 0.0  ;;  %v1051_v31 = vld [vmem:[%s1963_s14] sm:$0xff] }
 0x13d   : > { %v1048_v51 = vadd.f32 %v1047_v36, %v1046_v39  ;;  %v1110_v11 = vadd.f32 %v1109_v1, %v1108_v2 }
 0x13f   : > { %v1049_v60 = vadd.f32 %v1048_v51, %v1001_v47  ;;  %v1112_v14 = vadd.f32 %v1111_v10, %v1110_v11 }
 0x141   : > { %1050 = vst.msk [vmem:[%s1958_s16] sm:$0xff] %vm520_vm3, %v1049_v60  ;;  %v1114_v19 = vadd.f32 %v1113_v33, %v1112_v14 }
 0x143   : > { %v1116_v23 = vadd.f32 %v1115_v17, %v1114_v19 }
 0x145   : > { %v1118_v26 = vadd.f32 %v1117_v22, %v1116_v23 }
 0x147   : > { %v1120_v29 = vadd.f32 %v1119_v25, %v1118_v26 }
 0x149   : > { %v1122_v32 = vadd.f32 %v1121_v28, %v1120_v29 }
 0x14b   : > { %v1123_v35 = vadd.f32 %v1122_v32, %v1051_v31 }
 0x14d   : > { %1124 = vst.msk [vmem:[%s1963_s14] sm:$0xff] %vm520_vm3, %v1123_v35 }
 0x14e PF: > { %p1690_p11 = scmp.le.s32.totalorder %s2053_s20, 128 }
 0x14f   : > { %v1130_v36 = vlaneseq (!%p1690_p11)  ;;  %s1129_s21 = smul.u32 (!%p1690_p11), 48, %s1941_s17  ;;  %vm1309_vm5 = vcmask (!%p1690_p11), 130048  }
 0x150   : > { %1128 = sbr.rel (%p1690_p11) target bundleno = 423 (0x1a7), region = 56 }
 0x151   : > { %v2312_v38 = vshrl.u32 (!%p1690_p11), %v1130_v36, 7  ;;  %s1144_s22 = smul.u32 (!%p1690_p11), 192, %s1941_s17  ;;  %v1137_v39 = vstv (!%p1690_p11), %s1129_s21 }
 0x153   : > { %v1132_v42 = vadd.s32 (!%p1690_p11), 8, %v2312_v38  ;;  %v2316_v44 = vstv (!%p1690_p11), %s1144_s22  ;;  %v1133_v47 = vadd.s32 (!%p1690_p11), 16, %v2312_v38  ;;  %v1134_v48 = vadd.s32 (!%p1690_p11), 24, %v2312_v38 }
 0x154   : > { %v1135_v51 = vadd.s32 (!%p1690_p11), 32, %v2312_v38  ;;  %v1136_v53 = vadd.s32 (!%p1690_p11), 40, %v2312_v38  ;;  %v1138_v56 = vadd.s32 (!%p1690_p11), %v1137_v39, %v2312_v38  ;;  %v1145_v60 = vadd.s32 (!%p1690_p11), 48, %v2312_v38 }
 0x155   : > { %v1139_v57 = vadd.s32 (!%p1690_p11), %v1137_v39, %v1132_v42  ;;  %v2325_v62 = vadd.s32 (!%p1690_p11), 56, %v2312_v38  ;;  %v1140_v1 = vadd.s32 (!%p1690_p11), %v1137_v39, %v1133_v47  ;;  %v1141_v2 = vadd.s32 (!%p1690_p11), %v1137_v39, %v1134_v48 }
 0x156   : > { %v1142_v5 = vadd.s32 (!%p1690_p11), %v1137_v39, %v1135_v51  ;;  %v1143_v10 = vadd.s32 (!%p1690_p11), %v1137_v39, %v1136_v53  ;;  %v2328_v11 = vadd.s32 (!%p1690_p11), 64, %v2312_v38  ;;  %v2331_v13 = vadd.s32 (!%p1690_p11), 72, %v2312_v38 }
 0x157   : > { %v2334_v33 = vadd.s32 80, %v2312_v38  ;;  %v2337_v14 = vadd.s32 88, %v2312_v38  ;;  %v2340_v16 = vadd.s32 96, %v2312_v38  ;;  %v2343_v17 = vadd.s32 104, %v2312_v38 }
 0x158   : > { %v2346_v19 = vadd.s32 112, %v2312_v38  ;;  %v2349_v20 = vadd.s32 120, %v2312_v38  ;;  %v2352_v22 = vadd.s32 128, %v2312_v38  ;;  %v1164_v23 = vadd.s32 %v2316_v44, %v2312_v38 }
 0x159   : > { %v1165_v25 = vadd.s32 %v2316_v44, %v1132_v42  ;;  %vm1188_vm6 = vcmp.lt.s32.totalorder %v1138_v56, 128  ;;  %v1166_v26 = vadd.s32 %v2316_v44, %v1133_v47  ;;  %vm1189_vm7 = vcmp.lt.s32.totalorder %v1139_v57, 128 }
 0x15a   : > { %vm1190_vm8 = vcmp.lt.s32.totalorder %v1140_v1, 128  ;;  %vm1191_vm9 = vcmp.lt.s32.totalorder %v1141_v2, 128  ;;  %v2359_v28 = vadd.s32 136, %v2312_v38  ;;  %v1167_v29 = vadd.s32 %v2316_v44, %v1134_v48 }
 0x15b   : > { %vm1192_vm10 = vcmp.lt.s32.totalorder %v1142_v5, 128  ;;  %vm1193_vm11 = vcmp.lt.s32.totalorder %v1143_v10, 128  ;;  %v1168_v31 = vadd.s32 %v2316_v44, %v1135_v51  ;;  %v1169_v32 = vadd.s32 %v2316_v44, %v1136_v53 }
 0x15c   : > { %v2365_v35 = vadd.s32 %v2316_v44, %v1145_v60  ;;  %v1206_v36 = vsel %vm1188_vm6, %v2072_v49, 0.0  ;;  %v1207_v39 = vsel %vm1189_vm7, %v2069_v46, 0.0  ;;  %v1208_v42 = vsel %vm1190_vm8, %v2082_v61, 0.0 }
 0x15d   : > { %v1209_v47 = vsel %vm1191_vm9, %v2079_v58, 0.0  ;;  %vm1212_vm12 = vcmp.lt.s32.totalorder %v1164_v23, 512  ;;  %v1210_v48 = vsel %vm1192_vm10, %v2092_v9, 0.0  ;;  %v1211_v56 = vsel %vm1193_vm11, %v2089_v6, 0.0 }
 0x15e   : > { %vm1213_vm13 = vcmp.lt.s32.totalorder %v1165_v25, 512  ;;  %vm1214_vm14 = vcmp.lt.s32.totalorder %v1166_v26, 512  ;;  %vm1215_vm15 = vcmp.lt.s32.totalorder %v1167_v29, 512  ;;  %v1310_v51 = vsel %vm1309_vm5, %v1206_v36, 0.0  ;;  %v1308_v26 = vld [vmem:[%s1948_s23] sm:$0xff] }
 0x15f   : > { %v1311_v53 = vsel %vm1309_vm5, %v1207_v39, 0.0  ;;  %v1313_v49 = vsel %vm1309_vm5, %v1208_v42, 0.0  ;;  %vm1216_vm0 = vcmp.lt.s32.totalorder %v1168_v31, 512  ;;  %v2377_v46 = vsel %vm1212_vm12, %v2104_v21, 0.0 }
 0x160   : > { %v1312_v61 = vadd.f32 %v1311_v53, %v1310_v51  ;;  %v1315_v58 = vsel %vm1309_vm5, %v1209_v47, 0.0  ;;  %v1324_v57 = vmul.f32 %v1206_v36, %v1206_v36  ;;  %v1325_v9 = vmul.f32 %v1207_v39, %v1207_v39 }
 0x161   : > { %v1326_v60 = vmul.f32 %v1208_v42, %v1208_v42  ;;  %v1327_v6 = vmul.f32 %v1209_v47, %v1209_v47  ;;  %v2381_v1 = vsel %vm1213_vm13, %v2101_v18, 0.0  ;;  %v1317_v5 = vsel %vm1309_vm5, %v1210_v48, 0.0 }
 0x162   : > { %v1314_v2 = vadd.f32 %v1313_v49, %v1312_v61  ;;  %v1328_v10 = vmul.f32 %v1210_v48, %v1210_v48  ;;  %v1330_v23 = vsel %vm1309_vm5, %v1324_v57, 0.0  ;;  %v1331_v25 = vsel %vm1309_vm5, %v1325_v9, 0.0 }
 0x163   : > { %v1333_v21 = vsel %vm1309_vm5, %v1326_v60, 0.0  ;;  %v1344_v36 = vsel %vm520_vm3, %v2377_v46, 0.0  ;;  %v1286_v39 = vsel %vm1214_vm14, %v2116_v34, 0.0  ;;  %v1319_v18 = vsel %vm1309_vm5, %v1211_v56, 0.0 }
 0x164   : > { %v1316_v42 = vadd.f32 %v1315_v58, %v1314_v2  ;;  %v1332_v47 = vadd.f32 %v1331_v25, %v1330_v23  ;;  %v1329_v51 = vmul.f32 %v1211_v56, %v1211_v56  ;;  %v1335_v48 = vsel %vm1309_vm5, %v1327_v6, 0.0 }
 0x165   : > { %v1345_v53 = vsel %vm520_vm3, %v2381_v1, 0.0  ;;  %v1347_v49 = vsel %vm520_vm3, %v1286_v39, 0.0  ;;  %v1287_v61 = vsel %vm1215_vm15, %v2113_v30, 0.0  ;;  %v1171_v34 = vadd.s32 %v2316_v44, %v2325_v62 }
 0x166   : > { %v1318_v57 = vadd.f32 %v1317_v5, %v1316_v42  ;;  %v1334_v9 = vadd.f32 %v1333_v21, %v1332_v47  ;;  %v1346_v60 = vadd.f32 %v1345_v53, %v1344_v36  ;;  %vm1217_vm1 = vcmp.lt.s32.totalorder %v1169_v32, 512  ;;  %v1323_v36 = vld [vmem:[%s1953_s27] sm:$0xff] }
 0x167   : > { %v1337_v56 = vsel %vm1309_vm5, %v1328_v10, 0.0  ;;  %v1349_v58 = vsel %vm520_vm3, %v1287_v61, 0.0  ;;  %v1288_v6 = vsel %vm1216_vm0, %v2128_v50, 0.0  ;;  %v1172_v30 = vadd.s32 %v2316_v44, %v2328_v11 }
 0x168   : > { %v1320_v2 = vadd.f32 %v1319_v18, %v1318_v57  ;;  %v1336_v23 = vadd.f32 %v1335_v48, %v1334_v9  ;;  %v1348_v29 = vadd.f32 %v1347_v49, %v1346_v60  ;;  %vm1218_vm2 = vcmp.lt.s32.totalorder %v2365_v35, 512 }
 0x169   : > { %v1339_v62 = vsel %vm1309_vm5, %v1329_v51, 0.0  ;;  %v1351_v32 = vsel %vm520_vm3, %v1288_v6, 0.0  ;;  %v1289_v5 = vsel %vm1217_vm1, %v2125_v45, 0.0  ;;  %v2412_v50 = vadd.s32 144, %v2312_v38 }
 0x16a   : > { %v1321_v10 = vadd.f32 %v1320_v2, %v1308_v26  ;;  %v1338_v25 = vadd.f32 %v1337_v56, %v1336_v23  ;;  %v1350_v31 = vadd.f32 %v1349_v58, %v1348_v29  ;;  %v1173_v21 = vadd.s32 %v2316_v44, %v2331_v13 }
 0x16b   : > { %vm1219_vm4 = vcmp.lt.s32.totalorder %v1171_v34, 512  ;;  %v1353_v11 = vsel %vm520_vm3, %v1289_v5, 0.0  ;;  %v2419_v35 = vadd.s32 152, %v2312_v38  ;;  %v1290_v42 = vsel %vm1218_vm2, %v2140_v4, 0.0 }
 0x16c   : > { %1322 = vst.msk [vmem:[%s1948_s23] sm:$0xff] %vm1309_vm5, %v1321_v10  ;;  %v1340_v45 = vadd.f32 %v1339_v62, %v1338_v25  ;;  %v1352_v18 = vadd.f32 %v1351_v32, %v1350_v31  ;;  %v2425_v47 = vadd.s32 160, %v2312_v38  ;;  %v1174_v13 = vadd.s32 %v2316_v44, %v2334_v33 }
 0x16d   : > { %vm1220_vm6 = vcmp.lt.s32.totalorder %v1172_v30, 512  ;;  %v1355_v51 = vsel %vm520_vm3, %v1290_v42, 0.0  ;;  %v2431_v48 = vadd.s32 168, %v2312_v38  ;;  %v1291_v53 = vsel %vm1219_vm4, %v2137_v63, 0.0 }
 0x16e   : > { %v1341_v4 = vadd.f32 %v1340_v45, %v1323_v36  ;;  %v1354_v49 = vadd.f32 %v1353_v11, %v1352_v18  ;;  %v2435_v57 = vadd.s32 176, %v2312_v38  ;;  %v1175_v9 = vadd.s32 %v2316_v44, %v2337_v14 }
 0x16f   : > { %vm1221_vm7 = vcmp.lt.s32.totalorder %v1173_v21, 512  ;;  %v1357_v60 = vsel %vm520_vm3, %v1291_v53, 0.0  ;;  %v1176_v33 = vadd.s32 %v2316_v44, %v2340_v16  ;;  %v1292_v34 = vsel %vm1220_vm6, %v2067_v43, 0.0 }
 0x170   : > { %1342 = vst.msk [vmem:[%s1953_s27] sm:$0xff] %vm1309_vm5, %v1341_v4  ;;  %v1356_v26 = vadd.f32 %v1355_v51, %v1354_v49  ;;  %v1394_v63 = vmul.f32 %v2377_v46, %v2377_v46  ;;  %vm1222_vm8 = vcmp.lt.s32.totalorder %v1174_v13, 512  ;;  %v1359_v56 = vsel %vm520_vm3, %v1292_v34, 0.0 }
 0x171   : > { %v1395_v14 = vmul.f32 %v2381_v1, %v2381_v1  ;;  %v1396_v58 = vmul.f32 %v1286_v39, %v1286_v39  ;;  %v2451_v2 = vadd.s32 184, %v2312_v38  ;;  %v1177_v16 = vadd.s32 %v2316_v44, %v2343_v17 }
 0x172   : > { %v1293_v43 = vsel %vm1221_vm7, %v2065_v40, 0.0  ;;  %v1358_v23 = vadd.f32 %v1357_v60, %v1356_v26  ;;  %v1178_v29 = vadd.s32 %v2316_v44, %v2346_v19  ;;  %vm1223_vm5 = vcmp.lt.s32.totalorder %v1175_v9, 512 }
 0x173   : > { %v1361_v46 = vsel %vm520_vm3, %v1293_v43, 0.0  ;;  %v1397_v30 = vmul.f32 %v1287_v61, %v1287_v61  ;;  %vm1224_vm9 = vcmp.lt.s32.totalorder %v1176_v33, 512  ;;  %v1294_v1 = vsel %vm1222_vm8, %v2077_v55, 0.0 }
 0x174   : > { %v1360_v39 = vadd.f32 %v1359_v56, %v1358_v23  ;;  %v1418_v38 = vsel %vm520_vm3, %v1394_v63, 0.0  ;;  %v1363_v62 = vsel %vm520_vm3, %v1294_v1, 0.0  ;;  %v1398_v32 = vmul.f32 %v1288_v6, %v1288_v6 }
 0x175   : > { %v1419_v17 = vsel %vm520_vm3, %v1395_v14, 0.0  ;;  %v1421_v40 = vsel %vm520_vm3, %v1396_v58, 0.0  ;;  %v1179_v19 = vadd.s32 %v2316_v44, %v2349_v20  ;;  %v1295_v10 = vsel %vm1223_vm5, %v2075_v52, 0.0 }
 0x176   : > { %v1362_v25 = vadd.f32 %v1361_v46, %v1360_v39  ;;  %v1420_v61 = vadd.f32 %v1419_v17, %v1418_v38  ;;  %vm1225_vm10 = vcmp.lt.s32.totalorder %v1177_v16, 512  ;;  %v1365_v55 = vsel %vm520_vm3, %v1295_v10, 0.0 }
 0x177   : > { %v1399_v31 = vmul.f32 %v1289_v5, %v1289_v5  ;;  %v1423_v21 = vsel %vm520_vm3, %v1397_v30, 0.0  ;;  %v1180_v6 = vadd.s32 %v2316_v44, %v2352_v22  ;;  %v1296_v36 = vsel %vm1224_vm9, %v2087_v3, 0.0 }
 0x178   : > { %v1364_v11 = vadd.f32 %v1363_v62, %v1362_v25  ;;  %v1422_v45 = vadd.f32 %v1421_v40, %v1420_v61  ;;  %vm1226_vm11 = vcmp.lt.s32.totalorder %v1178_v29, 512  ;;  %v1367_v20 = vsel %vm520_vm3, %v1296_v36, 0.0 }
 0x179   : > { %v1400_v52 = vmul.f32 %v1290_v42, %v1290_v42  ;;  %v1425_v18 = vsel %vm520_vm3, %v1398_v32, 0.0  ;;  %v1181_v13 = vadd.s32 %v2316_v44, %v2359_v28  ;;  %v1297_v5 = vsel %vm1225_vm10, %v2085_v0, 0.0 }
 0x17a   : > { %v1366_v51 = vadd.f32 %v1365_v55, %v1364_v11  ;;  %v1424_v4 = vadd.f32 %v1423_v21, %v1422_v45  ;;  %vm1227_vm12 = vcmp.lt.s32.totalorder %v1179_v19, 512  ;;  %v1369_v22 = vsel %vm520_vm3, %v1297_v5, 0.0 }
 0x17b   : > { %v1401_v49 = vmul.f32 %v1291_v53, %v1291_v53  ;;  %v1427_v3 = vsel %vm520_vm3, %v1399_v31, 0.0  ;;  %v1182_v9 = vadd.s32 %v2316_v44, %v2412_v50  ;;  %v1298_v42 = vsel %vm1226_vm11, %v2098_v15, 0.0 }
 0x17c   : > { %v1368_v60 = vadd.f32 %v1367_v20, %v1366_v51  ;;  %v1426_v33 = vadd.f32 %v1425_v18, %v1424_v4  ;;  %vm1228_vm13 = vcmp.lt.s32.totalorder %v1180_v6, 512  ;;  %v1371_v28 = vsel %vm520_vm3, %v1298_v42, 0.0 }
 0x17d   : > { %v1402_v26 = vmul.f32 %v1292_v34, %v1292_v34  ;;  %v1429_v0 = vsel %vm520_vm3, %v1400_v52, 0.0  ;;  %v1183_v63 = vadd.s32 %v2316_v44, %v2419_v35  ;;  %v1299_v53 = vsel %vm1227_vm12, %v2095_v12, 0.0 }
 0x17e   : > { %v1370_v56 = vadd.f32 %v1369_v22, %v1368_v60  ;;  %v1428_v14 = vadd.f32 %v1427_v3, %v1426_v33  ;;  %vm1229_vm14 = vcmp.lt.s32.totalorder %v1181_v13, 512  ;;  %v1373_v50 = vsel %vm520_vm3, %v1299_v53, 0.0 }
 0x17f   : > { %v1403_v58 = vmul.f32 %v1293_v43, %v1293_v43  ;;  %v1431_v15 = vsel %vm520_vm3, %v1401_v49, 0.0  ;;  %v1184_v16 = vadd.s32 %v2316_v44, %v2425_v47  ;;  %v1300_v34 = vsel %vm1228_vm13, %v2110_v27, 0.0 }
 0x180   : > { %v1372_v23 = vadd.f32 %v1371_v28, %v1370_v56  ;;  %v1430_v29 = vadd.f32 %v1429_v0, %v1428_v14  ;;  %vm1230_vm15 = vcmp.lt.s32.totalorder %v1182_v9, 512  ;;  %v1375_v35 = vsel %vm520_vm3, %v1300_v34, 0.0 }
 0x181   : > { %v1404_v46 = vmul.f32 %v1294_v1, %v1294_v1  ;;  %v1433_v12 = vsel %vm520_vm3, %v1402_v26, 0.0  ;;  %v1185_v30 = vadd.s32 %v2316_v44, %v2431_v48  ;;  %v1301_v43 = vsel %vm1229_vm14, %v2107_v24, 0.0 }
 0x182   : > { %v1374_v39 = vadd.f32 %v1373_v50, %v1372_v23  ;;  %v1432_v38 = vadd.f32 %v1431_v15, %v1430_v29  ;;  %vm1231_vm0 = vcmp.lt.s32.totalorder %v1183_v63, 512  ;;  %v1377_v47 = vsel %vm520_vm3, %v1301_v43, 0.0 }
 0x183   : > { %v1405_v62 = vmul.f32 %v1295_v10, %v1295_v10  ;;  %v1435_v27 = vsel %vm520_vm3, %v1403_v58, 0.0  ;;  %v1186_v32 = vadd.s32 %v2316_v44, %v2435_v57  ;;  %v1302_v1 = vsel %vm1230_vm15, %v2122_v41, 0.0 }
 0x184   : > { %v1376_v17 = vadd.f32 %v1375_v35, %v1374_v39  ;;  %v1434_v40 = vadd.f32 %v1433_v12, %v1432_v38  ;;  %vm1232_vm1 = vcmp.lt.s32.totalorder %v1184_v16, 512  ;;  %v1379_v48 = vsel %vm520_vm3, %v1302_v1, 0.0 }
 0x185   : > { %v1406_v19 = vmul.f32 %v1296_v36, %v1296_v36  ;;  %v1437_v24 = vsel %vm520_vm3, %v1404_v46, 0.0  ;;  %v1187_v25 = vadd.s32 %v2316_v44, %v2451_v2  ;;  %v1303_v10 = vsel %vm1231_vm0, %v2119_v37, 0.0 }
 0x186   : > { %v1378_v61 = vadd.f32 %v1377_v47, %v1376_v17  ;;  %v1436_v55 = vadd.f32 %v1435_v27, %v1434_v40  ;;  %vm1233_vm2 = vcmp.lt.s32.totalorder %v1185_v30, 512  ;;  %v1381_v57 = vsel %vm520_vm3, %v1303_v10, 0.0 }
 0x187   : > { %v1407_v31 = vmul.f32 %v1297_v5, %v1297_v5  ;;  %v1439_v41 = vsel %vm520_vm3, %v1405_v62, 0.0  ;;  %v1304_v21 = vsel %vm1232_vm1, %v2134_v59, 0.0  ;;  %vm1234_vm4 = vcmp.lt.s32.totalorder %v1186_v32, 512 }
 0x188   : > { %v1380_v6 = vadd.f32 %v1379_v48, %v1378_v61  ;;  %v1438_v11 = vadd.f32 %v1437_v24, %v1436_v55  ;;  %v1383_v36 = vsel %vm520_vm3, %v1304_v21, 0.0  ;;  %v1408_v45 = vmul.f32 %v1298_v42, %v1298_v42 }
 0x189   : > { %v1441_v44 = vsel %vm520_vm3, %v1406_v19, 0.0  ;;  %v1305_v37 = vsel %vm1233_vm2, %v2131_v54, 0.0  ;;  %vm1235_vm6 = vcmp.lt.s32.totalorder %v1187_v25, 512  ;;  %v1409_v18 = vmul.f32 %v1299_v53, %v1299_v53 }
 0x18a   : > { %v1382_v2 = vadd.f32 %v1381_v57, %v1380_v6  ;;  %v1440_v20 = vadd.f32 %v1439_v41, %v1438_v11  ;;  %v1385_v52 = vsel %vm520_vm3, %v1305_v37, 0.0  ;;  %v1443_v13 = vsel %vm520_vm3, %v1407_v31, 0.0 }
 0x18b   : > { %v1306_v59 = vsel %vm1234_vm4, %v2145_v8, 0.0  ;;  %v1410_v22 = vmul.f32 %v1300_v34, %v1300_v34  ;;  %v1445_v49 = vsel %vm520_vm3, %v1408_v45, 0.0  ;;  %v1307_v54 = vsel %vm1235_vm6, %v2143_v7, 0.0  ;;  %v1343_v8 = vld [vmem:[%s1958_s16] sm:$0xff] }
 0x18c   : > { %v1384_v5 = vadd.f32 %v1383_v36, %v1382_v2  ;;  %v1442_v51 = vadd.f32 %v1441_v44, %v1440_v20  ;;  %v1387_v4 = vsel %vm520_vm3, %v1306_v59, 0.0  ;;  %v1389_v42 = vsel %vm520_vm3, %v1307_v54, 0.0 }
 0x18d   : > { %v1411_v60 = vmul.f32 %v1301_v43, %v1301_v43  ;;  %v1447_v33 = vsel %vm520_vm3, %v1409_v18, 0.0  ;;  %v1412_v0 = vmul.f32 %v1302_v1, %v1302_v1  ;;  %v1449_v63 = vsel %vm520_vm3, %v1410_v22, 0.0  ;;  %v1393_v1 = vld [vmem:[%s1963_s14] sm:$0xff] }
 0x18e   : > { %v1386_v3 = vadd.f32 %v1385_v52, %v1384_v5  ;;  %v1444_v9 = vadd.f32 %v1443_v13, %v1442_v51  ;;  %v1413_v14 = vmul.f32 %v1303_v10, %v1303_v10  ;;  %v1414_v15 = vmul.f32 %v1304_v21, %v1304_v21 }
 0x18f   : > { %v1451_v50 = vsel %vm520_vm3, %v1411_v60, 0.0  ;;  %v1453_v16 = vsel %vm520_vm3, %v1412_v0, 0.0  ;;  %v1415_v23 = vmul.f32 %v1305_v37, %v1305_v37  ;;  %v1416_v46 = vmul.f32 %v1306_v59, %v1306_v59 }
 0x190   : > { %v1388_v28 = vadd.f32 %v1387_v4, %v1386_v3  ;;  %v1446_v26 = vadd.f32 %v1445_v49, %v1444_v9  ;;  %v1455_v29 = vsel %vm520_vm3, %v1413_v14, 0.0  ;;  %v1457_v12 = vsel %vm520_vm3, %v1414_v15, 0.0 }
 0x191   : > { %v1417_v43 = vmul.f32 %v1307_v54, %v1307_v54  ;;  %v1459_v39 = vsel %vm520_vm3, %v1415_v23, 0.0  ;;  %v1461_v47 = vsel %vm520_vm3, %v1416_v46, 0.0 }
 0x192   : > { %v1390_v53 = vadd.f32 %v1389_v42, %v1388_v28  ;;  %v1448_v56 = vadd.f32 %v1447_v33, %v1446_v26 }
 0x193   : > { %v1463_v27 = vsel %vm520_vm3, %v1417_v43, 0.0 }
 0x194   : > { %v1391_v7 = vadd.f32 %v1390_v53, %v1343_v8  ;;  %v1450_v58 = vadd.f32 %v1449_v63, %v1448_v56 }
 0x196   : > { %1392 = vst.msk [vmem:[%s1958_s16] sm:$0xff] %vm520_vm3, %v1391_v7  ;;  %v1452_v34 = vadd.f32 %v1451_v50, %v1450_v58 }
 0x198   : > { %v1454_v35 = vadd.f32 %v1453_v16, %v1452_v34 }
 0x19a   : > { %v1456_v30 = vadd.f32 %v1455_v29, %v1454_v35 }
 0x19c   : > { %v1458_v38 = vadd.f32 %v1457_v12, %v1456_v30 }
 0x19e   : > { %v1460_v62 = vadd.f32 %v1459_v39, %v1458_v38 }
 0x1a0   : > { %v1462_v32 = vadd.f32 %v1461_v47, %v1460_v62 }
 0x1a2   : > { %v1464_v17 = vadd.f32 %v1463_v27, %v1462_v32 }
 0x1a4   : > { %v1465_v40 = vadd.f32 %v1464_v17, %v1393_v1 }
 0x1a6   : > { %1466 = vst.msk [vmem:[%s1963_s14] sm:$0xff] %vm520_vm3, %v1465_v40 }
 0x1a7 PF: > { %s20_s13 = sadd.s32 1, %s1855_s13   ;;  %s2567_s17 = sld [smem:[#allocation2_spill]] }
 0x1a8   : > { %p17_p12 = scmp.ge.s32.totalorder %s20_s13, 6   ;;  %s2568_s23 = sld [smem:[#allocation3_spill]] }
 0x1a9   : > { %s2569_s30 = smov %s1847_s11  ;;  %s2570_s10 = smov %s1851_s12 }
 0x1aa   :  { %19 = sbr.rel (!%p17_p12) target bundleno = 4 (0x4), region = 125 }
 0x1ad   : > { %s2571_s11 = smov %s2567_s17 }
 0x1ae   : > { %s2572_s12 = smov %s2568_s23 }

</bundles_post_ra>
